<compile_context>
chip_gen: v7x
topology: tpu7x:2x2x1
jax: 0.10.0
libtpu: 0.0.40
codegen_flags: <defaults>
</compile_context>

<pallas_src>
import jax
import jax.numpy as jnp
from jax.experimental import pallas as pl
from jax.experimental.pallas import tpu as pltpu

HIDDEN_TEXT = 768     # BERT hidden size
HIDDEN_IMG = 2048     # ResNet50 feature size
FUSE = 256            # shared fused-feature dim
NUM_CLASSES = 2
OUT_PAD = 128         # pad class dim to one full lane tile for a dense store


def _round_up(x, m):
    return ((x + m - 1) // m) * m


def _tpu_vmem_bytes():
    try:
        return int(pltpu.get_tpu_info().vmem_capacity_bytes)
    except Exception:
        return 64 << 20          # conservative (v7x per-TC VMEM)


def _choose_tiling(batch, tb_max):
    """Return (tb, steps, b_pad): batch tile rows, grid steps, padded batch."""
    b8 = _round_up(max(batch, 1), 8)
    if b8 <= 64:
        # Tiny batch: one grid step; pipelining / megacore split not worth it.
        return b8, 1, b8
    # Target ~8 grid steps so the activation DMA of tile i+1 overlaps compute
    # of tile i; keep the step count even to balance v7x's two TensorCores.
    tb = _round_up(pl.cdiv(b8, 8), 8)
    tb = max(64, min(tb, tb_max))
    steps = pl.cdiv(b8, tb)
    if steps % 2:
        steps += 1
    return tb, steps, steps * tb


def _softmax_last(x):
    m = jnp.max(x, axis=-1, keepdims=True)
    e = jnp.exp(x - m)
    return e * pl.reciprocal(jnp.sum(e, axis=-1, keepdims=True), approx=True)


def fused_multimodal_kernel(text_h_ref, img_h_ref,
                            w_tfc_ref, b_tfc_ref,
                            w_ifc_ref, b_ifc_ref,
                            w_at_ref, b_at_ref,
                            w_ai_ref, b_ai_ref,
                            w_out_ref, b_out_ref,
                            out_ref):
    # text_features = text_fc(text_hidden)            [TB, 256]  (bf16 MXU, f32 acc)
    text_feat = (jnp.dot(text_h_ref[...], w_tfc_ref[...],
                         preferred_element_type=jnp.float32) + b_tfc_ref[...])
    # image_features = image_fc(image_hidden)         [TB, 256]
    img_feat = (jnp.dot(img_h_ref[...], w_ifc_ref[...],
                        preferred_element_type=jnp.float32) + b_ifc_ref[...])

    # CrossModalAttention: per-modality linear + softmax (independent softmaxes,
    # matching the reference PyTorch module), weighted elementwise fusion.
    t_logits = (jnp.dot(text_feat.astype(jnp.bfloat16), w_at_ref[...],
                        preferred_element_type=jnp.float32) + b_at_ref[...])
    i_logits = (jnp.dot(img_feat.astype(jnp.bfloat16), w_ai_ref[...],
                        preferred_element_type=jnp.float32) + b_ai_ref[...])
    t_w = _softmax_last(t_logits)
    i_w = _softmax_last(i_logits)
    fused = t_w * text_feat + i_w * img_feat          # [TB, 256]  f32

    # final classifier fc(256 -> 2), weight column-padded to 128 lanes;
    # store bf16 (lane-dense vst, half the writeback traffic of f32).
    logits = (jnp.dot(fused.astype(jnp.bfloat16), w_out_ref[...],
                      preferred_element_type=jnp.float32) + b_out_ref[...])
    out_ref[...] = logits.astype(out_ref.dtype)


def multimodal_head(text_hidden, image_hidden, params):
    """Fused Pallas head. text_hidden: [B,768] bf16, image_hidden: [B,2048] bf16."""
    B = text_hidden.shape[0]

    vmem_cap = _tpu_vmem_bytes()
    tb_max = 1024 if vmem_cap >= (100 << 20) else 512   # 128 MiB parts vs v7x
    TB, steps, B_pad = _choose_tiling(B, tb_max)

    if B_pad != B:
        text_hidden = jnp.pad(text_hidden, ((0, B_pad - B), (0, 0)))
        image_hidden = jnp.pad(image_hidden, ((0, B_pad - B), (0, 0)))

    text_bf = text_hidden.astype(jnp.bfloat16)   # no-op: backbone stubs emit bf16
    img_bf = image_hidden.astype(jnp.bfloat16)

    inputs = [
        text_bf, img_bf,
        params["w_text_fc"], params["b_text_fc"],
        params["w_img_fc"], params["b_img_fc"],
        params["w_attn_text"], params["b_attn_text"],
        params["w_attn_img"], params["b_attn_img"],
        params["w_out_pad"], params["b_out_pad"],
    ]

    # Activations: tiled along batch.  Weights/biases: constant index_map, so
    # they are DMA'd once and stay resident in VMEM across all batch tiles.
    in_specs = [
        pl.BlockSpec((TB, HIDDEN_TEXT), lambda i: (i, 0)),
        pl.BlockSpec((TB, HIDDEN_IMG), lambda i: (i, 0)),
    ] + [pl.BlockSpec(p.shape, lambda i: (0, 0)) for p in inputs[2:]]
    out_spec = pl.BlockSpec((TB, OUT_PAD), lambda i: (i, 0))

    grid = (steps,)

    # VMEM budget: double-buffered bf16 activation tiles + bf16 output tiles,
    # resident weights (double-counted to be safe), f32 intermediates, headroom.
    weight_bytes = sum(int(p.size) * p.dtype.itemsize for p in inputs[2:])
    act_bytes = 2 * TB * (HIDDEN_TEXT + HIDDEN_IMG) * 2
    out_bytes = 2 * TB * OUT_PAD * 2
    scratch_bytes = 8 * TB * FUSE * 4
    vmem_limit = int(min(2 * weight_bytes + act_bytes + out_bytes + scratch_bytes
                         + (8 << 20),
                         vmem_cap - (16 << 20),
                         48 << 20))

    flops = 2 * B_pad * (HIDDEN_TEXT * FUSE + HIDDEN_IMG * FUSE
                         + 2 * FUSE * FUSE + FUSE * OUT_PAD)
    bytes_accessed = (weight_bytes
                      + B_pad * (HIDDEN_TEXT + HIDDEN_IMG) * 2
                      + B_pad * OUT_PAD * 2)
    cost = pl.CostEstimate(flops=flops,
                           transcendentals=2 * B_pad * FUSE,
                           bytes_accessed=bytes_accessed)

    out = pl.pallas_call(
        fused_multimodal_kernel,
        out_shape=jax.ShapeDtypeStruct((B_pad, OUT_PAD), jnp.bfloat16),
        grid=grid,
        in_specs=in_specs,
        out_specs=out_spec,
        compiler_params=pltpu.CompilerParams(
            dimension_semantics=("parallel",),
            vmem_limit_bytes=vmem_limit),
        cost_estimate=cost,
    )(*inputs)
    return out[:B, :NUM_CLASSES].astype(jnp.float32)


# ----------------------- deterministic parameter setup -----------------------

def _linear_init(key, fan_in, fan_out):
    kw, kb = jax.random.split(key)
    bound = 1.0 / jnp.sqrt(float(fan_in))
    w = jax.random.uniform(kw, (fan_in, fan_out), jnp.float32, -bound, bound)
    b = jax.random.uniform(kb, (1, fan_out), jnp.float32, -bound, bound)
    return w, b


def make_params(key):
    keys = jax.random.split(key, 8)
    p = {}
    w, b = _linear_init(keys[0], HIDDEN_TEXT, FUSE)
    p["w_text_fc"], p["b_text_fc"] = w.astype(jnp.bfloat16), b
    w, b = _linear_init(keys[1], HIDDEN_IMG, FUSE)
    p["w_img_fc"], p["b_img_fc"] = w.astype(jnp.bfloat16), b
    w, b = _linear_init(keys[2], FUSE, FUSE)
    p["w_attn_text"], p["b_attn_text"] = w.astype(jnp.bfloat16), b
    w, b = _linear_init(keys[3], FUSE, FUSE)
    p["w_attn_img"], p["b_attn_img"] = w.astype(jnp.bfloat16), b
    w_out, b_out = _linear_init(keys[4], FUSE, NUM_CLASSES)
    # zero-pad the 2-class head to a full 128-lane tile (padding columns zero)
    p["w_out_pad"] = (jnp.zeros((FUSE, OUT_PAD), jnp.float32)
                      .at[:, :NUM_CLASSES].set(w_out).astype(jnp.bfloat16))
    p["b_out_pad"] = jnp.zeros((1, OUT_PAD), jnp.float32).at[:, :NUM_CLASSES].set(b_out)
    # stand-in backbone parameters
    p["embed_table"] = 0.02 * jax.random.normal(keys[5], (100, HIDDEN_TEXT), jnp.float32)
    p["img_proj"] = 0.1 * jax.random.normal(keys[6], (3, HIDDEN_IMG), jnp.float32)
    return p


# ------------------------- backbone stand-ins (glue) -------------------------

def text_backbone_stub(input_ids, attention_mask, embed_table):
    # TODO(synk): pretrained BERT encoder + pooler not reproducible; stand-in is an
    # embedding lookup, attention-mask-weighted mean pool, and tanh (pooler-like).
    emb = embed_table[input_ids]                                  # [B, S, 768]
    mask = attention_mask[..., None].astype(jnp.float32)          # [B, S, 1]
    pooled = (emb * mask).sum(axis=1) / jnp.maximum(mask.sum(axis=1), 1.0)
    return jnp.tanh(pooled).astype(jnp.bfloat16)                  # [B, 768] bf16


def image_backbone_stub(image_nchw, img_proj):
    # TODO(synk): pretrained ResNet50 backbone not reproducible; stand-in is
    # NCHW->NHWC, global average pool, and a deterministic 3->2048 projection.
    x = jnp.transpose(image_nchw, (0, 2, 3, 1))                   # NHWC
    pooled = jnp.mean(x, axis=(1, 2))                             # [B, 3]
    return (pooled @ img_proj).astype(jnp.bfloat16)               # [B, 2048] bf16


def multimodal_predictor_forward(input_ids, attention_mask, image_tensor, params):
    text_hidden = text_backbone_stub(input_ids, attention_mask, params["embed_table"])
    image_hidden = image_backbone_stub(image_tensor, params["img_proj"])
    return multimodal_head(text_hidden, image_hidden, params)     # [B, 2] f32


if __name__ == "__main__":
    key = jax.random.PRNGKey(0)
    k_params, k_ids, k_img = jax.random.split(key, 3)

    B, S = 2, 8
    params = make_params(k_params)
    input_ids = jax.random.randint(k_ids, (B, S), 0, 100, dtype=jnp.int32)
    attention_mask = jnp.ones((B, S), dtype=jnp.int32)
    image_tensor = jax.random.normal(k_img, (B, 3, 16, 16), jnp.float32)  # NCHW

    fwd = jax.jit(multimodal_predictor_forward)
    logits = fwd(input_ids, attention_mask, image_tensor, params)
    logits = jax.block_until_ready(logits)
    assert logits.shape == (B, NUM_CLASSES)
    assert bool(jnp.all(jnp.isfinite(logits)))
    print("KERNEL_OK")
</pallas_src>

<mosaic_0001>
module attributes {stable_mosaic.version = 11 : i64} {
  func.func @fused_multimodal_kernel(%arg0: i32, %arg1: memref<8x768xbf16, #tpu.memory_space<vmem>>, %arg2: memref<8x2048xbf16, #tpu.memory_space<vmem>>, %arg3: memref<768x256xbf16, #tpu.memory_space<vmem>>, %arg4: memref<1x256xf32, #tpu.memory_space<vmem>>, %arg5: memref<2048x256xbf16, #tpu.memory_space<vmem>>, %arg6: memref<1x256xf32, #tpu.memory_space<vmem>>, %arg7: memref<256x256xbf16, #tpu.memory_space<vmem>>, %arg8: memref<1x256xf32, #tpu.memory_space<vmem>>, %arg9: memref<256x256xbf16, #tpu.memory_space<vmem>>, %arg10: memref<1x256xf32, #tpu.memory_space<vmem>>, %arg11: memref<256x128xbf16, #tpu.memory_space<vmem>>, %arg12: memref<1x128xf32, #tpu.memory_space<vmem>>, %arg13: memref<8x128xbf16, #tpu.memory_space<vmem>>) attributes {dimension_semantics = [#tpu.dimension_semantics<parallel>], iteration_bounds = array<i64: 1>, scalar_prefetch = 0 : i64, scratch_operands = 0 : i64, tpu.core_type = #tpu.core_type<tc>, window_params = [{transform_indices = @transform_0, window_bounds = array<i64: 8, 768>}, {transform_indices = @transform_1, window_bounds = array<i64: 8, 2048>}, {pipeline_mode = #tpu.pipeline_mode<synchronous>, transform_indices = @transform_2, window_bounds = array<i64: 768, 256>}, {pipeline_mode = #tpu.pipeline_mode<synchronous>, transform_indices = @transform_3, window_bounds = array<i64: 1, 256>}, {pipeline_mode = #tpu.pipeline_mode<synchronous>, transform_indices = @transform_4, window_bounds = array<i64: 2048, 256>}, {pipeline_mode = #tpu.pipeline_mode<synchronous>, transform_indices = @transform_5, window_bounds = array<i64: 1, 256>}, {pipeline_mode = #tpu.pipeline_mode<synchronous>, transform_indices = @transform_6, window_bounds = array<i64: 256, 256>}, {pipeline_mode = #tpu.pipeline_mode<synchronous>, transform_indices = @transform_7, window_bounds = array<i64: 1, 256>}, {pipeline_mode = #tpu.pipeline_mode<synchronous>, transform_indices = @transform_8, window_bounds = array<i64: 256, 256>}, {pipeline_mode = #tpu.pipeline_mode<synchronous>, transform_indices = @transform_9, window_bounds = array<i64: 1, 256>}, {pipeline_mode = #tpu.pipeline_mode<synchronous>, transform_indices = @transform_10, window_bounds = array<i64: 256, 128>}, {pipeline_mode = #tpu.pipeline_mode<synchronous>, transform_indices = @transform_11, window_bounds = array<i64: 1, 128>}, {transform_indices = @transform_12, window_bounds = array<i64: 8, 128>}]} {
    %c0 = arith.constant 0 : index
    %c0_0 = arith.constant 0 : index
    %0 = vector.load %arg1[%c0, %c0_0] : memref<8x768xbf16, #tpu.memory_space<vmem>>, vector<8x768xbf16>
    %c0_1 = arith.constant 0 : index
    %c0_2 = arith.constant 0 : index
    %1 = vector.load %arg3[%c0_1, %c0_2] : memref<768x256xbf16, #tpu.memory_space<vmem>>, vector<768x256xbf16>
    %cst = arith.constant dense<0.000000e+00> : vector<8x256xf32>
    %2 = tpu.matmul %0, %1, %cst {dimension_numbers = #tpu.dot_dimension_numbers<[1], [0], [0], [1], [0, 0, 1, 1], [], []>} : vector<8x768xbf16>, vector<768x256xbf16>, vector<8x256xf32> -> vector<8x256xf32>
    %c0_3 = arith.constant 0 : index
    %c0_4 = arith.constant 0 : index
    %3 = vector.load %arg4[%c0_3, %c0_4] : memref<1x256xf32, #tpu.memory_space<vmem>>, vector<1x256xf32>
    %4 = vector.broadcast %3 : vector<1x256xf32> to vector<8x256xf32>
    %5 = arith.addf %2, %4 : vector<8x256xf32>
    %c0_5 = arith.constant 0 : index
    %c0_6 = arith.constant 0 : index
    %6 = vector.load %arg2[%c0_5, %c0_6] : memref<8x2048xbf16, #tpu.memory_space<vmem>>, vector<8x2048xbf16>
    %c0_7 = arith.constant 0 : index
    %c0_8 = arith.constant 0 : index
    %7 = vector.load %arg5[%c0_7, %c0_8] : memref<2048x256xbf16, #tpu.memory_space<vmem>>, vector<2048x256xbf16>
    %cst_9 = arith.constant dense<0.000000e+00> : vector<8x256xf32>
    %8 = tpu.matmul %6, %7, %cst_9 {dimension_numbers = #tpu.dot_dimension_numbers<[1], [0], [0], [1], [0, 0, 1, 1], [], []>} : vector<8x2048xbf16>, vector<2048x256xbf16>, vector<8x256xf32> -> vector<8x256xf32>
    %c0_10 = arith.constant 0 : index
    %c0_11 = arith.constant 0 : index
    %9 = vector.load %arg6[%c0_10, %c0_11] : memref<1x256xf32, #tpu.memory_space<vmem>>, vector<1x256xf32>
    %10 = vector.broadcast %9 : vector<1x256xf32> to vector<8x256xf32>
    %11 = arith.addf %8, %10 : vector<8x256xf32>
    %12 = arith.truncf %5 : vector<8x256xf32> to vector<8x256xbf16>
    %c0_12 = arith.constant 0 : index
    %c0_13 = arith.constant 0 : index
    %13 = vector.load %arg7[%c0_12, %c0_13] : memref<256x256xbf16, #tpu.memory_space<vmem>>, vector<256x256xbf16>
    %cst_14 = arith.constant dense<0.000000e+00> : vector<8x256xf32>
    %14 = tpu.matmul %12, %13, %cst_14 {dimension_numbers = #tpu.dot_dimension_numbers<[1], [0], [0], [1], [0, 0, 1, 1], [], []>} : vector<8x256xbf16>, vector<256x256xbf16>, vector<8x256xf32> -> vector<8x256xf32>
    %c0_15 = arith.constant 0 : index
    %c0_16 = arith.constant 0 : index
    %15 = vector.load %arg8[%c0_15, %c0_16] : memref<1x256xf32, #tpu.memory_space<vmem>>, vector<1x256xf32>
    %16 = vector.broadcast %15 : vector<1x256xf32> to vector<8x256xf32>
    %17 = arith.addf %14, %16 : vector<8x256xf32>
    %18 = arith.truncf %11 : vector<8x256xf32> to vector<8x256xbf16>
    %c0_17 = arith.constant 0 : index
    %c0_18 = arith.constant 0 : index
    %19 = vector.load %arg9[%c0_17, %c0_18] : memref<256x256xbf16, #tpu.memory_space<vmem>>, vector<256x256xbf16>
    %cst_19 = arith.constant dense<0.000000e+00> : vector<8x256xf32>
    %20 = tpu.matmul %18, %19, %cst_19 {dimension_numbers = #tpu.dot_dimension_numbers<[1], [0], [0], [1], [0, 0, 1, 1], [], []>} : vector<8x256xbf16>, vector<256x256xbf16>, vector<8x256xf32> -> vector<8x256xf32>
    %c0_20 = arith.constant 0 : index
    %c0_21 = arith.constant 0 : index
    %21 = vector.load %arg10[%c0_20, %c0_21] : memref<1x256xf32, #tpu.memory_space<vmem>>, vector<1x256xf32>
    %22 = vector.broadcast %21 : vector<1x256xf32> to vector<8x256xf32>
    %23 = arith.addf %20, %22 : vector<8x256xf32>
    %cst_22 = arith.constant dense<0xFF800000> : vector<8xf32>
    %24 = vector.multi_reduction <maximumf>, %17, %cst_22 [1] : vector<8x256xf32> to vector<8xf32>
    %25 = vector.shape_cast %24 : vector<8xf32> to vector<8x1xf32>
    %26 = vector.broadcast %25 : vector<8x1xf32> to vector<8x256xf32>
    %27 = arith.subf %17, %26 : vector<8x256xf32>
    %28 = math.exp %27 : vector<8x256xf32>
    %cst_23 = arith.constant dense<0.000000e+00> : vector<8xf32>
    %29 = vector.multi_reduction <add>, %28, %cst_23 [1] : vector<8x256xf32> to vector<8xf32>
    %30 = vector.shape_cast %29 : vector<8xf32> to vector<8x1xf32>
    %31 = tpu.reciprocal %30 {approx = true} : vector<8x1xf32> -> vector<8x1xf32>
    %32 = vector.broadcast %31 : vector<8x1xf32> to vector<8x256xf32>
    %33 = arith.mulf %28, %32 : vector<8x256xf32>
    %cst_24 = arith.constant dense<0xFF800000> : vector<8xf32>
    %34 = vector.multi_reduction <maximumf>, %23, %cst_24 [1] : vector<8x256xf32> to vector<8xf32>
    %35 = vector.shape_cast %34 : vector<8xf32> to vector<8x1xf32>
    %36 = vector.broadcast %35 : vector<8x1xf32> to vector<8x256xf32>
    %37 = arith.subf %23, %36 : vector<8x256xf32>
    %38 = math.exp %37 : vector<8x256xf32>
    %cst_25 = arith.constant dense<0.000000e+00> : vector<8xf32>
    %39 = vector.multi_reduction <add>, %38, %cst_25 [1] : vector<8x256xf32> to vector<8xf32>
    %40 = vector.shape_cast %39 : vector<8xf32> to vector<8x1xf32>
    %41 = tpu.reciprocal %40 {approx = true} : vector<8x1xf32> -> vector<8x1xf32>
    %42 = vector.broadcast %41 : vector<8x1xf32> to vector<8x256xf32>
    %43 = arith.mulf %38, %42 : vector<8x256xf32>
    %44 = arith.mulf %33, %5 : vector<8x256xf32>
    %45 = arith.mulf %43, %11 : vector<8x256xf32>
    %46 = arith.addf %44, %45 : vector<8x256xf32>
    %47 = arith.truncf %46 : vector<8x256xf32> to vector<8x256xbf16>
    %c0_26 = arith.constant 0 : index
    %c0_27 = arith.constant 0 : index
    %48 = vector.load %arg11[%c0_26, %c0_27] : memref<256x128xbf16, #tpu.memory_space<vmem>>, vector<256x128xbf16>
    %cst_28 = arith.constant dense<0.000000e+00> : vector<8x128xf32>
    %49 = tpu.matmul %47, %48, %cst_28 {dimension_numbers = #tpu.dot_dimension_numbers<[1], [0], [0], [1], [0, 0, 1, 1], [], []>} : vector<8x256xbf16>, vector<256x128xbf16>, vector<8x128xf32> -> vector<8x128xf32>
    %c0_29 = arith.constant 0 : index
    %c0_30 = arith.constant 0 : index
    %50 = vector.load %arg12[%c0_29, %c0_30] : memref<1x128xf32, #tpu.memory_space<vmem>>, vector<1x128xf32>
    %51 = vector.broadcast %50 : vector<1x128xf32> to vector<8x128xf32>
    %52 = arith.addf %49, %51 : vector<8x128xf32>
    %53 = arith.truncf %52 : vector<8x128xf32> to vector<8x128xbf16>
    %c0_31 = arith.constant 0 : index
    %c0_32 = arith.constant 0 : index
    %54 = vector.load %arg13[%c0_31, %c0_32] : memref<8x128xbf16, #tpu.memory_space<vmem>>, vector<8x128xbf16>
    tpu.vector_store %arg13[%c0_31, %c0_32], %53 {strides = array<i32>} : memref<8x128xbf16, #tpu.memory_space<vmem>>, vector<8x128xbf16>,
    return
  }
  func.func @transform_0(%arg0: i32) -> (i32, i32) {
    %c0_i32 = arith.constant 0 : i32
    %c0_i32_0 = arith.constant 0 : i32
    return %arg0, %c0_i32 : i32, i32
  }
  func.func @transform_1(%arg0: i32) -> (i32, i32) {
    %c0_i32 = arith.constant 0 : i32
    %c0_i32_0 = arith.constant 0 : i32
    return %arg0, %c0_i32 : i32, i32
  }
  func.func @transform_2(%arg0: i32) -> (i32, i32) {
    %c0_i32 = arith.constant 0 : i32
    %c0_i32_0 = arith.constant 0 : i32
    %c0_i32_1 = arith.constant 0 : i32
    return %c0_i32, %c0_i32_0 : i32, i32
  }
  func.func @transform_3(%arg0: i32) -> (i32, i32) {
    %c0_i32 = arith.constant 0 : i32
    %c0_i32_0 = arith.constant 0 : i32
    %c0_i32_1 = arith.constant 0 : i32
    return %c0_i32, %c0_i32_0 : i32, i32
  }
  func.func @transform_4(%arg0: i32) -> (i32, i32) {
    %c0_i32 = arith.constant 0 : i32
    %c0_i32_0 = arith.constant 0 : i32
    %c0_i32_1 = arith.constant 0 : i32
    return %c0_i32, %c0_i32_0 : i32, i32
  }
  func.func @transform_5(%arg0: i32) -> (i32, i32) {
    %c0_i32 = arith.constant 0 : i32
    %c0_i32_0 = arith.constant 0 : i32
    %c0_i32_1 = arith.constant 0 : i32
    return %c0_i32, %c0_i32_0 : i32, i32
  }
  func.func @transform_6(%arg0: i32) -> (i32, i32) {
    %c0_i32 = arith.constant 0 : i32
    %c0_i32_0 = arith.constant 0 : i32
    %c0_i32_1 = arith.constant 0 : i32
    return %c0_i32, %c0_i32_0 : i32, i32
  }
  func.func @transform_7(%arg0: i32) -> (i32, i32) {
    %c0_i32 = arith.constant 0 : i32
    %c0_i32_0 = arith.constant 0 : i32
    %c0_i32_1 = arith.constant 0 : i32
    return %c0_i32, %c0_i32_0 : i32, i32
  }
  func.func @transform_8(%arg0: i32) -> (i32, i32) {
    %c0_i32 = arith.constant 0 : i32
    %c0_i32_0 = arith.constant 0 : i32
    %c0_i32_1 = arith.constant 0 : i32
    return %c0_i32, %c0_i32_0 : i32, i32
  }
  func.func @transform_9(%arg0: i32) -> (i32, i32) {
    %c0_i32 = arith.constant 0 : i32
    %c0_i32_0 = arith.constant 0 : i32
    %c0_i32_1 = arith.constant 0 : i32
    return %c0_i32, %c0_i32_0 : i32, i32
  }
  func.func @transform_10(%arg0: i32) -> (i32, i32) {
    %c0_i32 = arith.constant 0 : i32
    %c0_i32_0 = arith.constant 0 : i32
    %c0_i32_1 = arith.constant 0 : i32
    return %c0_i32, %c0_i32_0 : i32, i32
  }
  func.func @transform_11(%arg0: i32) -> (i32, i32) {
    %c0_i32 = arith.constant 0 : i32
    %c0_i32_0 = arith.constant 0 : i32
    %c0_i32_1 = arith.constant 0 : i32
    return %c0_i32, %c0_i32_0 : i32, i32
  }
  func.func @transform_12(%arg0: i32) -> (i32, i32) {
    %c0_i32 = arith.constant 0 : i32
    %c0_i32_0 = arith.constant 0 : i32
    return %arg0, %c0_i32 : i32, i32
  }
}

</mosaic_0001>

<bundles_post_ra>
// kernel: multimodal_predictor_forward.1
= control target key start
LH: loop header
LB: loop body
LE: loop exit
PB: predicated region body
PF: predicated region fallthrough
CT: control target
= control target key end

     0   :  { %17 = vsyncpa [#allocation3], 0  ;;  %s5423_s0 = inlined_call_operand.vmem [shape: bf16[8,768], index: 0, kind: input, shape index: {}]   ;;  %s5424_s1 = inlined_call_operand.vmem [shape: bf16[8,2048], index: 1, kind: input, shape index: {}]   ;;  %s5425_s2 = inlined_call_operand.vmem [shape: bf16[768,256], index: 2, kind: input, shape index: {}]   ;;  %s5426_s3 = inlined_call_operand.vmem [shape: f32[1,256], index: 3, kind: input, shape index: {}]   ;;  %s5427_s4 = inlined_call_operand.hbm [shape: bf16[2048,256], index: 4, kind: input, shape index: {}]   ;;  %s5428_s5 = inlined_call_operand.vmem [shape: f32[1,256], index: 5, kind: input, shape index: {}]   ;;  %s5429_s6 = inlined_call_operand.vmem [shape: bf16[256,256], index: 6, kind: input, shape index: {}]   ;;  %s5430_s7 = inlined_call_operand.vmem [shape: f32[1,256], index: 7, kind: input, shape index: {}]   ;;  %s5431_s8 = inlined_call_operand.vmem [shape: bf16[256,256], index: 8, kind: input, shape index: {}]   ;;  %s5432_s9 = inlined_call_operand.vmem [shape: f32[1,256], index: 9, kind: input, shape index: {}]   ;;  %s5433_s10 = inlined_call_operand.hbm [shape: bf16[256,128], index: 10, kind: input, shape index: {}]   ;;  %s5434_s11 = inlined_call_operand.vmem [shape: f32[1,128], index: 11, kind: input, shape index: {}]   ;;  %s5435_s12 = inlined_call_operand.vmem [shape: bf16[8,128], index: 12, kind: output, shape index: {}]  }
   0x1   :  { %18 = vsyncpa [#allocation5], 0  ;;  %s4703_s21 = smov [#allocation2]   ;;  %s4655_s25 = scalar_lea.hbm %s5427_s4, 32768 }
   0x2   :  { %s32_s22 = sshll.u32 %s4703_s21, 4  ;;  %p4656_p0 = scmp.ne.s32.totalorder %s5427_s4, %s4655_s25  ;;  %s33_s22 = int_to_ptr.vmem [resolvable:$true] %s32_s22 }
   0x3   :  { %p4659_p1 = scmp.lt.u32.totalorder %s4655_s25, %s5427_s4 }
   0x5   :  { %p4661_p2 = pnand %p4659_p1, %p4656_p0 }
   0x7   :  { %4664 = shalt.err (!%p4661_p2)
}
   0x8   :  { %s4665_s30 = scalar_lea.vmem %s33_s22, 32768  ;;  %p4670_p4 = scmp.lt.s32.totalorder %s33_s22, %s33_s22 }
   0x9   :  { %p4666_p3 = scmp.ne.s32.totalorder %s33_s22, %s4665_s30  ;;  %p4671_p5 = scmp.lt.s32.totalorder %s4665_s30, %s4665_s30 }
   0xb   :  { %p4672_p6 = por %p4671_p5, %p4670_p4 }
   0xd   :  { %p4673_p7 = pnand %p4672_p6, %p4666_p3 }
   0xf   :  { %4676 = shalt.err (!%p4673_p7)
}
  0x10   :  { %s4704_s13 = smov 128   ;;  %s4705_s14 = smov 8  }
  0x11   :  { %38 = dma.hbm_to_vmem [thread:$0]  %s5427_s4, 32768, %s33_s22, [#allocation3], %s4704_s13, %s4704_s13, %s4705_s14  }
  0x12   :  { %s4706_s17 = smov [#allocation4]   ;;  %s4677_s21 = scalar_lea.hbm %s5433_s10, 2048 }
  0x13   :  { %s54_s18 = sshll.u32 %s4706_s17, 4  ;;  %p4678_p8 = scmp.ne.s32.totalorder %s5433_s10, %s4677_s21  ;;  %s55_s18 = int_to_ptr.vmem [resolvable:$true] %s54_s18 }
  0x14   :  { %p4681_p9 = scmp.lt.u32.totalorder %s4677_s21, %s5433_s10 }
  0x16   :  { %p4683_p10 = pnand %p4681_p9, %p4678_p8 }
  0x18   :  { %4686 = shalt.err (!%p4683_p10)
}
  0x19   :  { %s4687_s27 = scalar_lea.vmem %s55_s18, 2048  ;;  %p4692_p12 = scmp.lt.s32.totalorder %s55_s18, %s55_s18 }
  0x1a   :  { %p4688_p11 = scmp.ne.s32.totalorder %s55_s18, %s4687_s27  ;;  %p4693_p13 = scmp.lt.s32.totalorder %s4687_s27, %s4687_s27 }
  0x1c   :  { %p4694_p0 = por %p4693_p13, %p4692_p12 }
  0x1e   :  { %p4695_p1 = pnand %p4694_p0, %p4688_p11 }
  0x20   :  { %4698 = shalt.err (!%p4695_p1)
}
  0x21   :  { %s4707_s4 = smov 64   ;;  %s4708_s22 = smov 4  }
  0x22   :  { %60 = dma.hbm_to_vmem [thread:$0]  %s5433_s10, 2048, %s55_s18, [#allocation5], %s4707_s4, %s4707_s4, %s4708_s22  }
  0x23   :  { %4699 = dma.done.wait [#allocation3], 32768  }
  0x24   :  { %4700 = vsyncadd [#allocation3], 4294934528 }
  0x25   :  { %4701 = dma.done.wait [#allocation5], 2048  }
  0x26   :  { %4702 = vsyncadd [#allocation5], 4294965248  ;;  %v3981_v0 = vld [vmem:[%s5425_s2 + $0x4] ss:$8 sps:$4 sm:$0xff]   ;;  %v3985_v2 = vld [vmem:[%s5425_s2] ss:$8 sps:$4 sm:$0xff]  }
  0x27   :  { %v3983_v1 = vld [vmem:[#allocation2 + $0x104] ss:$8 sps:$4 sm:$0xff]   ;;  %682 = vmatprep.subr.bf16.mxu0 %v3981_v0  ;;  %v3986_v3 = vld [vmem:[#allocation2 + $0x100] ss:$8 sps:$4 sm:$0xff]   ;;  %v3987_v4 = vld [vmem:[%s5425_s2 + $0x14] ss:$8 sps:$4 sm:$0xff]  }
  0x28   :  { %2458 = vmatprep.subr.bf16.mxu1 %v3983_v1  ;;  %683 = vmatpush1.bf16.msra.mxu0 %v3985_v2  ;;  %v3989_v5 = vld [vmem:[#allocation2 + $0x114] ss:$8 sps:$4 sm:$0xff]   ;;  %v3991_v6 = vld [vmem:[%s5425_s2 + $0x10] ss:$8 sps:$4 sm:$0xff]   ;;  %v3993_v8 = vld [vmem:[%s5425_s2 + $0x24] ss:$8 sps:$4 sm:$0xff]  }
  0x29   :  { %2459 = vmatpush1.bf16.msra.mxu1 %v3986_v3  ;;  %684 = vmatprep.subr.bf16.mxu0 %v3987_v4  ;;  %v3992_v7 = vld [vmem:[#allocation2 + $0x110] ss:$8 sps:$4 sm:$0xff]   ;;  %v3995_v9 = vld [vmem:[#allocation2 + $0x124] ss:$8 sps:$4 sm:$0xff]   ;;  %v3997_v10 = vld [vmem:[%s5425_s2 + $0x20] ss:$8 sps:$4 sm:$0xff]  }
  0x2a   :  { %2460 = vmatprep.subr.bf16.mxu1 %v3989_v5  ;;  %v3998_v11 = vld [vmem:[#allocation2 + $0x120] ss:$8 sps:$4 sm:$0xff]   ;;  %v3999_v12 = vld [vmem:[%s5425_s2 + $0x34] ss:$8 sps:$4 sm:$0xff]   ;;  %v4003_v14 = vld [vmem:[%s5425_s2 + $0x30] ss:$8 sps:$4 sm:$0xff]  }
  0x2b   :  { %v4001_v13 = vld [vmem:[#allocation2 + $0x134] ss:$8 sps:$4 sm:$0xff]   ;;  %v4004_v15 = vld [vmem:[#allocation2 + $0x130] ss:$8 sps:$4 sm:$0xff]   ;;  %v4005_v16 = vld [vmem:[%s5425_s2 + $0x44] ss:$8 sps:$4 sm:$0xff]  }
  0x2c   :  { %685 = vmatpush1.bf16.msra.mxu0 %v3991_v6  ;;  %v4007_v17 = vld [vmem:[#allocation2 + $0x144] ss:$8 sps:$4 sm:$0xff]   ;;  %v4009_v18 = vld [vmem:[%s5425_s2 + $0x40] ss:$8 sps:$4 sm:$0xff]   ;;  %v4011_v20 = vld [vmem:[%s5425_s2 + $0x54] ss:$8 sps:$4 sm:$0xff]  }
  0x2d   :  { %2461 = vmatpush1.bf16.msra.mxu1 %v3992_v7  ;;  %686 = vmatprep.subr.bf16.mxu0 %v3993_v8  ;;  %v4010_v19 = vld [vmem:[#allocation2 + $0x140] ss:$8 sps:$4 sm:$0xff]   ;;  %v4013_v21 = vld [vmem:[#allocation2 + $0x154] ss:$8 sps:$4 sm:$0xff]   ;;  %v4015_v22 = vld [vmem:[%s5425_s2 + $0x50] ss:$8 sps:$4 sm:$0xff]  }
  0x2e   :  { %2462 = vmatprep.subr.bf16.mxu1 %v3995_v9  ;;  %v4016_v23 = vld [vmem:[#allocation2 + $0x150] ss:$8 sps:$4 sm:$0xff]   ;;  %v4017_v24 = vld [vmem:[%s5425_s2 + $0x64] ss:$8 sps:$4 sm:$0xff]   ;;  %v4021_v26 = vld [vmem:[%s5425_s2 + $0x60] ss:$8 sps:$4 sm:$0xff]  }
  0x2f   :  { %v4019_v25 = vld [vmem:[#allocation2 + $0x164] ss:$8 sps:$4 sm:$0xff]   ;;  %v4022_v27 = vld [vmem:[#allocation2 + $0x160] ss:$8 sps:$4 sm:$0xff]   ;;  %v4023_v28 = vld [vmem:[%s5425_s2 + $0x74] ss:$8 sps:$4 sm:$0xff]  }
  0x30   :  { %687 = vmatpush1.bf16.msra.mxu0 %v3997_v10  ;;  %v4025_v29 = vld [vmem:[#allocation2 + $0x174] ss:$8 sps:$4 sm:$0xff]   ;;  %v4027_v30 = vld [vmem:[%s5425_s2 + $0x70] ss:$8 sps:$4 sm:$0xff]   ;;  %v4029_v32 = vld [vmem:[%s5425_s2 + $0x84] ss:$8 sps:$4 sm:$0xff]  }
  0x31   :  { %2463 = vmatpush1.bf16.msra.mxu1 %v3998_v11  ;;  %688 = vmatprep.subr.bf16.mxu0 %v3999_v12  ;;  %v4028_v31 = vld [vmem:[#allocation2 + $0x170] ss:$8 sps:$4 sm:$0xff]   ;;  %v4031_v33 = vld [vmem:[#allocation2 + $0x184] ss:$8 sps:$4 sm:$0xff]   ;;  %v4033_v34 = vld [vmem:[%s5425_s2 + $0x80] ss:$8 sps:$4 sm:$0xff]  }
  0x32   :  { %2464 = vmatprep.subr.bf16.mxu1 %v4001_v13  ;;  %v4034_v35 = vld [vmem:[#allocation2 + $0x180] ss:$8 sps:$4 sm:$0xff]   ;;  %v4035_v36 = vld [vmem:[%s5425_s2 + $0x94] ss:$8 sps:$4 sm:$0xff]   ;;  %v4039_v38 = vld [vmem:[%s5425_s2 + $0x90] ss:$8 sps:$4 sm:$0xff]  }
  0x33   :  { %v4037_v37 = vld [vmem:[#allocation2 + $0x194] ss:$8 sps:$4 sm:$0xff]   ;;  %v4040_v39 = vld [vmem:[#allocation2 + $0x190] ss:$8 sps:$4 sm:$0xff]   ;;  %v4041_v40 = vld [vmem:[%s5425_s2 + $0xa4] ss:$8 sps:$4 sm:$0xff]  }
  0x34   :  { %689 = vmatpush1.bf16.msra.mxu0 %v4003_v14  ;;  %v4043_v41 = vld [vmem:[#allocation2 + $0x1a4] ss:$8 sps:$4 sm:$0xff]   ;;  %v4045_v42 = vld [vmem:[%s5425_s2 + $0xa0] ss:$8 sps:$4 sm:$0xff]   ;;  %v4047_v44 = vld [vmem:[%s5425_s2 + $0xb4] ss:$8 sps:$4 sm:$0xff]  }
  0x35   :  { %2465 = vmatpush1.bf16.msra.mxu1 %v4004_v15  ;;  %690 = vmatprep.subr.bf16.mxu0 %v4005_v16  ;;  %v4046_v43 = vld [vmem:[#allocation2 + $0x1a0] ss:$8 sps:$4 sm:$0xff]   ;;  %v4049_v45 = vld [vmem:[#allocation2 + $0x1b4] ss:$8 sps:$4 sm:$0xff]   ;;  %v4051_v47 = vld [vmem:[%s5425_s2 + $0xb0] ss:$8 sps:$4 sm:$0xff]  }
  0x36   :  { %2466 = vmatprep.subr.bf16.mxu1 %v4007_v17  ;;  %v70_v46 = vld [vmem:[%s5423_s0] sm:$0xff]  ;;  %v4052_v49 = vld [vmem:[#allocation2 + $0x1b0] ss:$8 sps:$4 sm:$0xff]   ;;  %v806_v50 = vld [vmem:[%s5424_s1 + $0x8] sm:$0xff] }
  0x37   :  { %v3461_v48 = vcombine.high %v70_v46, %v70_v46  ;;  %v4053_v51 = vld [vmem:[%s5425_s2 + $0xc4] ss:$8 sps:$4 sm:$0xff]   ;;  %v3565_v53 = vcombine.high %v806_v50, %v806_v50  ;;  %v4057_v54 = vld [vmem:[%s5425_s2 + $0xc0] ss:$8 sps:$4 sm:$0xff]   ;;  %v4059_v56 = vld [vmem:[%s5425_s2 + $0xd4] ss:$8 sps:$4 sm:$0xff]   ;;  %v3460_v6 = vcombine.low %v70_v46, %v70_v46  ;;  %v3564_v7 = vcombine.low %v806_v50, %v806_v50 }
  0x38   :  { %691 = vmatpush1.bf16.msra.mxu0 %v4009_v18  ;;  %v4055_v52 = vld [vmem:[#allocation2 + $0x1c4] ss:$8 sps:$4 sm:$0xff]   ;;  %v4058_v55 = vld [vmem:[#allocation2 + $0x1c0] ss:$8 sps:$4 sm:$0xff]   ;;  %v4061_v57 = vld [vmem:[#allocation2 + $0x1d4] ss:$8 sps:$4 sm:$0xff]  }
  0x39   :  { %2467 = vmatpush1.bf16.msra.mxu1 %v4010_v19  ;;  %692 = vmatprep.subr.bf16.mxu0 %v4011_v20  ;;  %v4063_v58 = vld [vmem:[%s5425_s2 + $0xd0] ss:$8 sps:$4 sm:$0xff]   ;;  %v4065_v60 = vld [vmem:[%s5425_s2 + $0xe4] ss:$8 sps:$4 sm:$0xff]   ;;  %v4069_v62 = vld [vmem:[%s5425_s2 + $0xe0] ss:$8 sps:$4 sm:$0xff]  }
  0x3a   :  { %2468 = vmatprep.subr.bf16.mxu1 %v4013_v21  ;;  %714 = vmatprep.mubr.bf16.mxu0 %v3461_v48  ;;  %v4064_v59 = vld [vmem:[#allocation2 + $0x1d0] ss:$8 sps:$4 sm:$0xff]   ;;  %v4067_v61 = vld [vmem:[#allocation2 + $0x1e4] ss:$8 sps:$4 sm:$0xff]   ;;  %v4070_v63 = vld [vmem:[#allocation2 + $0x1e0] ss:$8 sps:$4 sm:$0xff]  }
  0x3b   :  { %2490 = vmatprep.mubr.bf16.mxu1 %v3565_v53  ;;  %v4071_v0 = vld [vmem:[%s5425_s2 + $0xf4] ss:$8 sps:$4 sm:$0xff]   ;;  %v4075_v2 = vld [vmem:[%s5425_s2 + $0xf0] ss:$8 sps:$4 sm:$0xff]   ;;  %v4081_v4 = vld [vmem:[%s5425_s2 + $0x104] ss:$8 sps:$4 sm:$0xff]  }
  0x3c   :  { %693 = vmatpush1.bf16.msra.mxu0 %v4015_v22  ;;  %v4073_v1 = vld [vmem:[#allocation2 + $0x1f4] ss:$8 sps:$4 sm:$0xff]   ;;  %v4076_v3 = vld [vmem:[#allocation2 + $0x1f0] ss:$8 sps:$4 sm:$0xff]   ;;  %v4086_v5 = vld [vmem:[#allocation2 + $0x204] ss:$8 sps:$4 sm:$0xff]  }
  0x3d   :  { %2469 = vmatpush1.bf16.msra.mxu1 %v4016_v23  ;;  %694 = vmatprep.subr.bf16.mxu0 %v4017_v24  ;;  %v4079_v8 = vld [vmem:[%s5425_s2 + $0x100] ss:$8 sps:$4 sm:$0xff]   ;;  %v4089_v10 = vld [vmem:[%s5425_s2 + $0x114] ss:$8 sps:$4 sm:$0xff]   ;;  %v4087_v12 = vld [vmem:[%s5425_s2 + $0x110] ss:$8 sps:$4 sm:$0xff]  }
  0x3e   :  { %2470 = vmatprep.subr.bf16.mxu1 %v4019_v25  ;;  %v4084_v9 = vld [vmem:[#allocation2 + $0x200] ss:$8 sps:$4 sm:$0xff]   ;;  %v4092_v11 = vld [vmem:[#allocation2 + $0x214] ss:$8 sps:$4 sm:$0xff]   ;;  %v4090_v13 = vld [vmem:[#allocation2 + $0x210] ss:$8 sps:$4 sm:$0xff]  }
  0x3f   :  { %v4095_v14 = vld [vmem:[%s5425_s2 + $0x124] ss:$8 sps:$4 sm:$0xff]   ;;  %v4093_v16 = vld [vmem:[%s5425_s2 + $0x120] ss:$8 sps:$4 sm:$0xff]   ;;  %v4101_v18 = vld [vmem:[%s5425_s2 + $0x134] ss:$8 sps:$4 sm:$0xff]  }
  0x40   :  { %695 = vmatpush1.bf16.msra.mxu0 %v4021_v26  ;;  %v4098_v15 = vld [vmem:[#allocation2 + $0x224] ss:$8 sps:$4 sm:$0xff]   ;;  %v4096_v17 = vld [vmem:[#allocation2 + $0x220] ss:$8 sps:$4 sm:$0xff]   ;;  %v4104_v19 = vld [vmem:[#allocation2 + $0x234] ss:$8 sps:$4 sm:$0xff]  }
  0x41   :  { %2471 = vmatpush1.bf16.msra.mxu1 %v4022_v27  ;;  %696 = vmatprep.subr.bf16.mxu0 %v4023_v28  ;;  %v4099_v20 = vld [vmem:[%s5425_s2 + $0x130] ss:$8 sps:$4 sm:$0xff]   ;;  %v4107_v22 = vld [vmem:[%s5425_s2 + $0x144] ss:$8 sps:$4 sm:$0xff]   ;;  %v4105_v24 = vld [vmem:[%s5425_s2 + $0x140] ss:$8 sps:$4 sm:$0xff]  }
  0x42   :  { %2472 = vmatprep.subr.bf16.mxu1 %v4025_v29  ;;  %v4102_v21 = vld [vmem:[#allocation2 + $0x230] ss:$8 sps:$4 sm:$0xff]   ;;  %v4110_v23 = vld [vmem:[#allocation2 + $0x244] ss:$8 sps:$4 sm:$0xff]   ;;  %v4108_v25 = vld [vmem:[#allocation2 + $0x240] ss:$8 sps:$4 sm:$0xff]  }
  0x43   :  { %v4113_v26 = vld [vmem:[%s5425_s2 + $0x154] ss:$8 sps:$4 sm:$0xff]   ;;  %v4111_v28 = vld [vmem:[%s5425_s2 + $0x150] ss:$8 sps:$4 sm:$0xff]   ;;  %v4143_v50 = vld [vmem:[%s5425_s2 + $0x1a4] ss:$8 sps:$4 sm:$0xff]  }
  0x44   :  { %697 = vmatpush1.bf16.msra.mxu0 %v4027_v30  ;;  %v4116_v27 = vld [vmem:[#allocation2 + $0x254] ss:$8 sps:$4 sm:$0xff]   ;;  %v4114_v29 = vld [vmem:[#allocation2 + $0x250] ss:$8 sps:$4 sm:$0xff]   ;;  %v4119_v30 = vld [vmem:[%s5425_s2 + $0x164] ss:$8 sps:$4 sm:$0xff]  }
  0x45   :  { %2473 = vmatpush1.bf16.msra.mxu1 %v4028_v31  ;;  %698 = vmatprep.subr.bf16.mxu0 %v4029_v32  ;;  %v4122_v31 = vld [vmem:[#allocation2 + $0x264] ss:$8 sps:$4 sm:$0xff]   ;;  %v4137_v46 = vld [vmem:[%s5425_s2 + $0x194] ss:$8 sps:$4 sm:$0xff]   ;;  %v4135_v48 = vld [vmem:[%s5425_s2 + $0x190] ss:$8 sps:$4 sm:$0xff]  }
  0x46   :  { %2474 = vmatprep.subr.bf16.mxu1 %v4031_v33  ;;  %v4942_v32 = vld [vmem:[%s5423_s0 + $0x8] sm:$0xff] }
  0x47   :  { %v4117_v33 = vld [vmem:[%s5425_s2 + $0x160] ss:$8 sps:$4 sm:$0xff]  }
  0x48   :  { %699 = vmatpush1.bf16.msra.mxu0 %v4033_v34  ;;  %v4120_v34 = vld [vmem:[#allocation2 + $0x260] ss:$8 sps:$4 sm:$0xff]  }
  0x49   :  { %2475 = vmatpush1.bf16.msra.mxu1 %v4034_v35  ;;  %700 = vmatprep.subr.bf16.mxu0 %v4035_v36  ;;  %v3463_v35 = vcombine.high %v4942_v32, %v4942_v32  ;;  %v4952_v36 = vld [vmem:[%s5424_s1 + $0x10] sm:$0xff]  ;;  %v4144_v53 = vld [vmem:[#allocation2 + $0x2a0] ss:$8 sps:$4 sm:$0xff]  }
  0x4a   :  { %2476 = vmatprep.subr.bf16.mxu1 %v4037_v37  ;;  %v4125_v37 = vld [vmem:[%s5425_s2 + $0x174] ss:$8 sps:$4 sm:$0xff]  }
  0x4c   :  { %701 = vmatpush1.bf16.msra.mxu0 %v4039_v38  ;;  %v3567_v38 = vcombine.high %v4952_v36, %v4952_v36 }
  0x4d   :  { %2477 = vmatpush1.bf16.msra.mxu1 %v4040_v39  ;;  %702 = vmatprep.subr.bf16.mxu0 %v4041_v40  ;;  %v4128_v39 = vld [vmem:[#allocation2 + $0x274] ss:$8 sps:$4 sm:$0xff]   ;;  %v4123_v40 = vld [vmem:[%s5425_s2 + $0x170] ss:$8 sps:$4 sm:$0xff]  }
  0x4e   :  { %2478 = vmatprep.subr.bf16.mxu1 %v4043_v41  ;;  %v4126_v41 = vld [vmem:[#allocation2 + $0x270] ss:$8 sps:$4 sm:$0xff]  }
  0x50   :  { %703 = vmatpush1.bf16.msra.mxu0 %v4045_v42  ;;  %v4131_v42 = vld [vmem:[%s5425_s2 + $0x184] ss:$8 sps:$4 sm:$0xff]  }
  0x51   :  { %2479 = vmatpush1.bf16.msra.mxu1 %v4046_v43  ;;  %704 = vmatprep.subr.bf16.mxu0 %v4047_v44  ;;  %v4134_v43 = vld [vmem:[#allocation2 + $0x284] ss:$8 sps:$4 sm:$0xff]   ;;  %v4129_v44 = vld [vmem:[%s5425_s2 + $0x180] ss:$8 sps:$4 sm:$0xff]  }
  0x52   :  { %2480 = vmatprep.subr.bf16.mxu1 %v4049_v45  ;;  %v4132_v45 = vld [vmem:[#allocation2 + $0x280] ss:$8 sps:$4 sm:$0xff]  }
  0x54   :  { %705 = vmatpush1.bf16.msra.mxu0 %v4051_v47  ;;  %v4140_v47 = vld [vmem:[#allocation2 + $0x294] ss:$8 sps:$4 sm:$0xff]  }
  0x55   :  { %2481 = vmatpush1.bf16.msra.mxu1 %v4052_v49  ;;  %706 = vmatprep.subr.bf16.mxu0 %v4053_v51  ;;  %v4138_v49 = vld [vmem:[#allocation2 + $0x290] ss:$8 sps:$4 sm:$0xff]   ;;  %v4146_v51 = vld [vmem:[#allocation2 + $0x2a4] ss:$8 sps:$4 sm:$0xff]  }
  0x56   :  { %2482 = vmatprep.subr.bf16.mxu1 %v4055_v52  ;;  %v4141_v52 = vld [vmem:[%s5425_s2 + $0x1a0] ss:$8 sps:$4 sm:$0xff]  }
  0x58   :  { %707 = vmatpush1.bf16.msra.mxu0 %v4057_v54  ;;  %v4149_v54 = vld [vmem:[%s5425_s2 + $0x1b4] ss:$8 sps:$4 sm:$0xff]  }
  0x59   :  { %2483 = vmatpush1.bf16.msra.mxu1 %v4058_v55  ;;  %708 = vmatprep.subr.bf16.mxu0 %v4059_v56  ;;  %v4152_v55 = vld [vmem:[#allocation2 + $0x2b4] ss:$8 sps:$4 sm:$0xff]   ;;  %v4147_v56 = vld [vmem:[%s5425_s2 + $0x1b0] ss:$8 sps:$4 sm:$0xff]  }
  0x5a   :  { %2484 = vmatprep.subr.bf16.mxu1 %v4061_v57  ;;  %v4150_v57 = vld [vmem:[#allocation2 + $0x2b0] ss:$8 sps:$4 sm:$0xff]  }
  0x5c   :  { %709 = vmatpush1.bf16.msra.mxu0 %v4063_v58  ;;  %v4155_v58 = vld [vmem:[%s5425_s2 + $0x1c4] ss:$8 sps:$4 sm:$0xff]  }
  0x5d   :  { %2485 = vmatpush1.bf16.msra.mxu1 %v4064_v59  ;;  %710 = vmatprep.subr.bf16.mxu0 %v4065_v60  ;;  %v4158_v59 = vld [vmem:[#allocation2 + $0x2c4] ss:$8 sps:$4 sm:$0xff]   ;;  %v4153_v60 = vld [vmem:[%s5425_s2 + $0x1c0] ss:$8 sps:$4 sm:$0xff]  }
  0x5e   :  { %2486 = vmatprep.subr.bf16.mxu1 %v4067_v61  ;;  %v4156_v61 = vld [vmem:[#allocation2 + $0x2c0] ss:$8 sps:$4 sm:$0xff]  }
  0x60   :  { %711 = vmatpush1.bf16.msra.mxu0 %v4069_v62  ;;  %v4161_v62 = vld [vmem:[%s5425_s2 + $0x1d4] ss:$8 sps:$4 sm:$0xff]  }
  0x61   :  { %2487 = vmatpush1.bf16.msra.mxu1 %v4070_v63  ;;  %712 = vmatprep.subr.bf16.mxu0 %v4071_v0  ;;  %v4164_v63 = vld [vmem:[#allocation2 + $0x2d4] ss:$8 sps:$4 sm:$0xff]   ;;  %v4159_v0 = vld [vmem:[%s5425_s2 + $0x1d0] ss:$8 sps:$4 sm:$0xff]  }
  0x62   :  { %2488 = vmatprep.subr.bf16.mxu1 %v4073_v1  ;;  %v4162_v1 = vld [vmem:[#allocation2 + $0x2d0] ss:$8 sps:$4 sm:$0xff]  }
  0x64   :  { %713 = vmatpush1.bf16.msra.mxu0 %v4075_v2  ;;  %v4167_v2 = vld [vmem:[%s5425_s2 + $0x1e4] ss:$8 sps:$4 sm:$0xff]  }
  0x65   :  { %2489 = vmatpush1.bf16.msra.mxu1 %v4076_v3  ;;  %723 = vmatprep.subr.bf16.mxu0 %v4081_v4  ;;  %v4170_v3 = vld [vmem:[#allocation2 + $0x2e4] ss:$8 sps:$4 sm:$0xff]   ;;  %v4165_v4 = vld [vmem:[%s5425_s2 + $0x1e0] ss:$8 sps:$4 sm:$0xff]  }
  0x66   :  { %2499 = vmatprep.subr.bf16.mxu1 %v4086_v5  ;;  %v4168_v5 = vld [vmem:[#allocation2 + $0x2e0] ss:$8 sps:$4 sm:$0xff]  }
  0x67   :  { %715 = vmatmul.mubr.bf16.vlgmr.msra.gmra.mrb[0].mxu0 %v3460_v6  ;;  %v4173_v6 = vld [vmem:[%s5425_s2 + $0x1f4] ss:$8 sps:$4 sm:$0xff]  }
  0x68   :  { %2491 = vmatmul.mubr.bf16.vlgmr.msra.gmra.mrb[0].mxu1 %v3564_v7  ;;  %724 = vmatpush1.bf16.msra.mxu0 %v4079_v8  ;;  %v4176_v7 = vld [vmem:[#allocation2 + $0x2f4] ss:$8 sps:$4 sm:$0xff]   ;;  %v4171_v8 = vld [vmem:[%s5425_s2 + $0x1f0] ss:$8 sps:$4 sm:$0xff]  }
  0x69   :  { %2500 = vmatpush1.bf16.msra.mxu1 %v4084_v9  ;;  %725 = vmatprep.subr.bf16.mxu0 %v4089_v10  ;;  %v4174_v9 = vld [vmem:[#allocation2 + $0x2f0] ss:$8 sps:$4 sm:$0xff]   ;;  %v4181_v10 = vld [vmem:[%s5425_s2 + $0x204] ss:$8 sps:$4 sm:$0xff]  }
  0x6a   :  { %2501 = vmatprep.subr.bf16.mxu1 %v4092_v11  ;;  %755 = vmatprep.mubr.bf16.mxu0 %v3463_v35  ;;  %v4186_v11 = vld [vmem:[#allocation2 + $0x304] ss:$8 sps:$4 sm:$0xff]   ;;  %v4208_v35 = vld [vmem:[#allocation2 + $0x340] ss:$8 sps:$4 sm:$0xff]  }
  0x6b   :  { %2531 = vmatprep.mubr.bf16.mxu1 %v3567_v38  ;;  %v4211_v38 = vld [vmem:[%s5425_s2 + $0x250] ss:$8 sps:$4 sm:$0xff]  }
  0x6c   :  { %726 = vmatpush1.bf16.msra.mxu0 %v4087_v12  ;;  %v3462_v12 = vcombine.low %v4942_v32, %v4942_v32  ;;  %v4207_v32 = vld [vmem:[%s5425_s2 + $0x244] ss:$8 sps:$4 sm:$0xff]  }
  0x6d   :  { %2502 = vmatpush1.bf16.msra.mxu1 %v4090_v13  ;;  %727 = vmatprep.subr.bf16.mxu0 %v4095_v14  ;;  %v4179_v13 = vld [vmem:[%s5425_s2 + $0x200] ss:$8 sps:$4 sm:$0xff]   ;;  %v3566_v14 = vcombine.low %v4952_v36, %v4952_v36  ;;  %v4213_v36 = vld [vmem:[%s5425_s2 + $0x254] ss:$8 sps:$4 sm:$0xff]  }
  0x6e   :  { %2503 = vmatprep.subr.bf16.mxu1 %v4098_v15  ;;  %v4184_v15 = vld [vmem:[#allocation2 + $0x300] ss:$8 sps:$4 sm:$0xff]  }
  0x70   :  { %728 = vmatpush1.bf16.msra.mxu0 %v4093_v16  ;;  %v4189_v16 = vld [vmem:[%s5425_s2 + $0x214] ss:$8 sps:$4 sm:$0xff]  }
  0x71   :  { %2504 = vmatpush1.bf16.msra.mxu1 %v4096_v17  ;;  %729 = vmatprep.subr.bf16.mxu0 %v4101_v18  ;;  %v4192_v17 = vld [vmem:[#allocation2 + $0x314] ss:$8 sps:$4 sm:$0xff]  }
  0x72   :  { %2505 = vmatprep.subr.bf16.mxu1 %v4104_v19  ;;  %v5026_v18 = vld [vmem:[%s5423_s0 + $0x10] sm:$0xff]  ;;  %v5031_v19 = vld [vmem:[%s5424_s1 + $0x18] sm:$0xff] }
  0x74   :  { %730 = vmatpush1.bf16.msra.mxu0 %v4099_v20  ;;  %v3465_v20 = vcombine.high %v5026_v18, %v5026_v18 }
  0x75   :  { %2506 = vmatpush1.bf16.msra.mxu1 %v4102_v21  ;;  %731 = vmatprep.subr.bf16.mxu0 %v4107_v22  ;;  %v3569_v21 = vcombine.high %v5031_v19, %v5031_v19  ;;  %v4187_v22 = vld [vmem:[%s5425_s2 + $0x210] ss:$8 sps:$4 sm:$0xff]  }
  0x76   :  { %2507 = vmatprep.subr.bf16.mxu1 %v4110_v23  ;;  %v4190_v23 = vld [vmem:[#allocation2 + $0x310] ss:$8 sps:$4 sm:$0xff]  }
  0x78   :  { %732 = vmatpush1.bf16.msra.mxu0 %v4105_v24  ;;  %v4195_v24 = vld [vmem:[%s5425_s2 + $0x224] ss:$8 sps:$4 sm:$0xff]  }
  0x79   :  { %2508 = vmatpush1.bf16.msra.mxu1 %v4108_v25  ;;  %733 = vmatprep.subr.bf16.mxu0 %v4113_v26  ;;  %v4198_v25 = vld [vmem:[#allocation2 + $0x324] ss:$8 sps:$4 sm:$0xff]   ;;  %v4193_v26 = vld [vmem:[%s5425_s2 + $0x220] ss:$8 sps:$4 sm:$0xff]  }
  0x7a   :  { %2509 = vmatprep.subr.bf16.mxu1 %v4116_v27  ;;  %v4196_v27 = vld [vmem:[#allocation2 + $0x320] ss:$8 sps:$4 sm:$0xff]  }
  0x7c   :  { %734 = vmatpush1.bf16.msra.mxu0 %v4111_v28  ;;  %v4201_v28 = vld [vmem:[%s5425_s2 + $0x234] ss:$8 sps:$4 sm:$0xff]  }
  0x7d   :  { %2510 = vmatpush1.bf16.msra.mxu1 %v4114_v29  ;;  %735 = vmatprep.subr.bf16.mxu0 %v4119_v30  ;;  %v4204_v29 = vld [vmem:[#allocation2 + $0x334] ss:$8 sps:$4 sm:$0xff]   ;;  %v4199_v30 = vld [vmem:[%s5425_s2 + $0x230] ss:$8 sps:$4 sm:$0xff]  }
  0x7e   :  { %2511 = vmatprep.subr.bf16.mxu1 %v4122_v31  ;;  %v4202_v31 = vld [vmem:[#allocation2 + $0x330] ss:$8 sps:$4 sm:$0xff]  }
  0x80   :  { %736 = vmatpush1.bf16.msra.mxu0 %v4117_v33  ;;  %v4210_v33 = vld [vmem:[#allocation2 + $0x344] ss:$8 sps:$4 sm:$0xff]  }
  0x81   :  { %2512 = vmatpush1.bf16.msra.mxu1 %v4120_v34  ;;  %737 = vmatprep.subr.bf16.mxu0 %v4125_v37  ;;  %v4205_v34 = vld [vmem:[%s5425_s2 + $0x240] ss:$8 sps:$4 sm:$0xff]   ;;  %v4216_v37 = vld [vmem:[#allocation2 + $0x354] ss:$8 sps:$4 sm:$0xff]  }
  0x82   :  { %2513 = vmatprep.subr.bf16.mxu1 %v4128_v39  ;;  %v4214_v39 = vld [vmem:[#allocation2 + $0x350] ss:$8 sps:$4 sm:$0xff]  }
  0x84   :  { %738 = vmatpush1.bf16.msra.mxu0 %v4123_v40  ;;  %v4219_v40 = vld [vmem:[%s5425_s2 + $0x264] ss:$8 sps:$4 sm:$0xff]  }
  0x85   :  { %2514 = vmatpush1.bf16.msra.mxu1 %v4126_v41  ;;  %739 = vmatprep.subr.bf16.mxu0 %v4131_v42  ;;  %v4222_v41 = vld [vmem:[#allocation2 + $0x364] ss:$8 sps:$4 sm:$0xff]   ;;  %v4217_v42 = vld [vmem:[%s5425_s2 + $0x260] ss:$8 sps:$4 sm:$0xff]  }
  0x86   :  { %2515 = vmatprep.subr.bf16.mxu1 %v4134_v43  ;;  %v4220_v43 = vld [vmem:[#allocation2 + $0x360] ss:$8 sps:$4 sm:$0xff]  }
  0x88   :  { %740 = vmatpush1.bf16.msra.mxu0 %v4129_v44  ;;  %v4225_v44 = vld [vmem:[%s5425_s2 + $0x274] ss:$8 sps:$4 sm:$0xff]  }
  0x89   :  { %2516 = vmatpush1.bf16.msra.mxu1 %v4132_v45  ;;  %741 = vmatprep.subr.bf16.mxu0 %v4137_v46  ;;  %v4228_v45 = vld [vmem:[#allocation2 + $0x374] ss:$8 sps:$4 sm:$0xff]   ;;  %v4223_v46 = vld [vmem:[%s5425_s2 + $0x270] ss:$8 sps:$4 sm:$0xff]  }
  0x8a   :  { %2517 = vmatprep.subr.bf16.mxu1 %v4140_v47  ;;  %v4226_v47 = vld [vmem:[#allocation2 + $0x370] ss:$8 sps:$4 sm:$0xff]  }
  0x8c   :  { %742 = vmatpush1.bf16.msra.mxu0 %v4135_v48  ;;  %v4231_v48 = vld [vmem:[%s5425_s2 + $0x284] ss:$8 sps:$4 sm:$0xff]  }
  0x8d   :  { %2518 = vmatpush1.bf16.msra.mxu1 %v4138_v49  ;;  %743 = vmatprep.subr.bf16.mxu0 %v4143_v50  ;;  %v4234_v49 = vld [vmem:[#allocation2 + $0x384] ss:$8 sps:$4 sm:$0xff]   ;;  %v4229_v50 = vld [vmem:[%s5425_s2 + $0x280] ss:$8 sps:$4 sm:$0xff]  }
  0x8e   :  { %2519 = vmatprep.subr.bf16.mxu1 %v4146_v51  ;;  %v4232_v51 = vld [vmem:[#allocation2 + $0x380] ss:$8 sps:$4 sm:$0xff]  }
  0x90   :  { %744 = vmatpush1.bf16.msra.mxu0 %v4141_v52  ;;  %v4237_v52 = vld [vmem:[%s5425_s2 + $0x294] ss:$8 sps:$4 sm:$0xff]  }
  0x91   :  { %2520 = vmatpush1.bf16.msra.mxu1 %v4144_v53  ;;  %745 = vmatprep.subr.bf16.mxu0 %v4149_v54  ;;  %v4240_v53 = vld [vmem:[#allocation2 + $0x394] ss:$8 sps:$4 sm:$0xff]   ;;  %v4235_v54 = vld [vmem:[%s5425_s2 + $0x290] ss:$8 sps:$4 sm:$0xff]  }
  0x92   :  { %2521 = vmatprep.subr.bf16.mxu1 %v4152_v55  ;;  %v4238_v55 = vld [vmem:[#allocation2 + $0x390] ss:$8 sps:$4 sm:$0xff]  }
  0x94   :  { %746 = vmatpush1.bf16.msra.mxu0 %v4147_v56  ;;  %v4243_v56 = vld [vmem:[%s5425_s2 + $0x2a4] ss:$8 sps:$4 sm:$0xff]  }
  0x95   :  { %2522 = vmatpush1.bf16.msra.mxu1 %v4150_v57  ;;  %747 = vmatprep.subr.bf16.mxu0 %v4155_v58  ;;  %v4246_v57 = vld [vmem:[#allocation2 + $0x3a4] ss:$8 sps:$4 sm:$0xff]   ;;  %v4241_v58 = vld [vmem:[%s5425_s2 + $0x2a0] ss:$8 sps:$4 sm:$0xff]  }
  0x96   :  { %2523 = vmatprep.subr.bf16.mxu1 %v4158_v59  ;;  %v4244_v59 = vld [vmem:[#allocation2 + $0x3a0] ss:$8 sps:$4 sm:$0xff]  }
  0x98   :  { %748 = vmatpush1.bf16.msra.mxu0 %v4153_v60  ;;  %v4249_v60 = vld [vmem:[%s5425_s2 + $0x2b4] ss:$8 sps:$4 sm:$0xff]  }
  0x99   :  { %2524 = vmatpush1.bf16.msra.mxu1 %v4156_v61  ;;  %749 = vmatprep.subr.bf16.mxu0 %v4161_v62  ;;  %v4252_v61 = vld [vmem:[#allocation2 + $0x3b4] ss:$8 sps:$4 sm:$0xff]   ;;  %v4247_v62 = vld [vmem:[%s5425_s2 + $0x2b0] ss:$8 sps:$4 sm:$0xff]  }
  0x9a   :  { %2525 = vmatprep.subr.bf16.mxu1 %v4164_v63  ;;  %v4250_v63 = vld [vmem:[#allocation2 + $0x3b0] ss:$8 sps:$4 sm:$0xff]  }
  0x9c   :  { %750 = vmatpush1.bf16.msra.mxu0 %v4159_v0  ;;  %v4255_v0 = vld [vmem:[%s5425_s2 + $0x2c4] ss:$8 sps:$4 sm:$0xff]  }
  0x9d   :  { %2526 = vmatpush1.bf16.msra.mxu1 %v4162_v1  ;;  %751 = vmatprep.subr.bf16.mxu0 %v4167_v2  ;;  %v4258_v1 = vld [vmem:[#allocation2 + $0x3c4] ss:$8 sps:$4 sm:$0xff]   ;;  %v4253_v2 = vld [vmem:[%s5425_s2 + $0x2c0] ss:$8 sps:$4 sm:$0xff]  }
  0x9e   :  { %2527 = vmatprep.subr.bf16.mxu1 %v4170_v3  ;;  %v4256_v3 = vld [vmem:[#allocation2 + $0x3c0] ss:$8 sps:$4 sm:$0xff]  }
  0xa0   :  { %752 = vmatpush1.bf16.msra.mxu0 %v4165_v4  ;;  %v4261_v4 = vld [vmem:[%s5425_s2 + $0x2d4] ss:$8 sps:$4 sm:$0xff]  }
  0xa1   :  { %2528 = vmatpush1.bf16.msra.mxu1 %v4168_v5  ;;  %753 = vmatprep.subr.bf16.mxu0 %v4173_v6  ;;  %v4264_v5 = vld [vmem:[#allocation2 + $0x3d4] ss:$8 sps:$4 sm:$0xff]   ;;  %v4259_v6 = vld [vmem:[%s5425_s2 + $0x2d0] ss:$8 sps:$4 sm:$0xff]  }
  0xa2   :  { %2529 = vmatprep.subr.bf16.mxu1 %v4176_v7  ;;  %v4262_v7 = vld [vmem:[#allocation2 + $0x3d0] ss:$8 sps:$4 sm:$0xff]  }
  0xa4   :  { %754 = vmatpush1.bf16.msra.mxu0 %v4171_v8  ;;  %v4267_v8 = vld [vmem:[%s5425_s2 + $0x2e4] ss:$8 sps:$4 sm:$0xff]  }
  0xa5   :  { %2530 = vmatpush1.bf16.msra.mxu1 %v4174_v9  ;;  %764 = vmatprep.subr.bf16.mxu0 %v4181_v10  ;;  %v4270_v9 = vld [vmem:[#allocation2 + $0x3e4] ss:$8 sps:$4 sm:$0xff]   ;;  %v4265_v10 = vld [vmem:[%s5425_s2 + $0x2e0] ss:$8 sps:$4 sm:$0xff]  }
  0xa6   :  { %2540 = vmatprep.subr.bf16.mxu1 %v4186_v11  ;;  %v4268_v11 = vld [vmem:[#allocation2 + $0x3e0] ss:$8 sps:$4 sm:$0xff]  }
  0xa7   :  { %756 = vmatmul.mubr.bf16.vlgmr.msra.gmra.mrb[0].mxu0 %v3462_v12  ;;  %v4273_v12 = vld [vmem:[%s5425_s2 + $0x2f4] ss:$8 sps:$4 sm:$0xff]  }
  0xa8   :  { %2532 = vmatmul.mubr.bf16.vlgmr.msra.gmra.mrb[0].mxu1 %v3566_v14  ;;  %765 = vmatpush1.bf16.msra.mxu0 %v4179_v13  ;;  %v4276_v13 = vld [vmem:[#allocation2 + $0x3f4] ss:$8 sps:$4 sm:$0xff]   ;;  %v4271_v14 = vld [vmem:[%s5425_s2 + $0x2f0] ss:$8 sps:$4 sm:$0xff]  }
  0xa9   :  { %2541 = vmatpush1.bf16.msra.mxu1 %v4184_v15  ;;  %766 = vmatprep.subr.bf16.mxu0 %v4189_v16  ;;  %v4274_v15 = vld [vmem:[#allocation2 + $0x3f0] ss:$8 sps:$4 sm:$0xff]   ;;  %v4283_v16 = vld [vmem:[#allocation2 + $0x404] ss:$8 sps:$4 sm:$0xff]  }
  0xaa   :  { %2542 = vmatprep.subr.bf16.mxu1 %v4192_v17  ;;  %796 = vmatprep.mubr.bf16.mxu0 %v3465_v20  ;;  %v5127_v17 = vld [vmem:[%s5424_s1 + $0x20] sm:$0xff] }
  0xab   :  { %2572 = vmatprep.mubr.bf16.mxu1 %v3569_v21  ;;  %v4354_v20 = vld [vmem:[#allocation2 + $0x4] ss:$8 sps:$4 sm:$0xff]   ;;  %v3464_v21 = vcombine.low %v5026_v18, %v5026_v18  ;;  %v4358_v18 = vld [vmem:[#allocation2 + $0x10] ss:$8 sps:$4 sm:$0xff]  }
  0xac   :  { %767 = vmatpush1.bf16.msra.mxu0 %v4187_v22  ;;  %v3568_v22 = vcombine.low %v5031_v19, %v5031_v19  ;;  %v4287_v19 = vld [vmem:[#allocation2 + $0x420] ss:$8 sps:$4 sm:$0xff]  }
  0xad   :  { %2543 = vmatpush1.bf16.msra.mxu1 %v4190_v23  ;;  %768 = vmatprep.subr.bf16.mxu0 %v4195_v24  ;;  %v4281_v23 = vld [vmem:[#allocation2 + $0x400] ss:$8 sps:$4 sm:$0xff]   ;;  %v4286_v24 = vld [vmem:[#allocation2 + $0x414] ss:$8 sps:$4 sm:$0xff]  }
  0xae   :  { %2544 = vmatprep.subr.bf16.mxu1 %v4198_v25  ;;  %v3571_v25 = vcombine.high %v5127_v17, %v5127_v17 }
  0xb0   :  { %769 = vmatpush1.bf16.msra.mxu0 %v4193_v26  ;;  %v4352_v26 = vld [vmem:[#allocation2] ss:$8 sps:$4 sm:$0xff]  }
  0xb1   :  { %2545 = vmatpush1.bf16.msra.mxu1 %v4196_v27  ;;  %770 = vmatprep.subr.bf16.mxu0 %v4201_v28  ;;  %v4360_v27 = vld [vmem:[#allocation2 + $0x14] ss:$8 sps:$4 sm:$0xff]   ;;  %v4284_v28 = vld [vmem:[#allocation2 + $0x410] ss:$8 sps:$4 sm:$0xff]  }
  0xb2   :  { %2546 = vmatprep.subr.bf16.mxu1 %v4204_v29  ;;  %v4289_v29 = vld [vmem:[#allocation2 + $0x424] ss:$8 sps:$4 sm:$0xff]  }
  0xb4   :  { %771 = vmatpush1.bf16.msra.mxu0 %v4199_v30  ;;  %v4366_v30 = vld [vmem:[#allocation2 + $0x24] ss:$8 sps:$4 sm:$0xff]  }
  0xb5   :  { %2547 = vmatpush1.bf16.msra.mxu1 %v4202_v31  ;;  %772 = vmatprep.subr.bf16.mxu0 %v4207_v32  ;;  %v4292_v31 = vld [vmem:[#allocation2 + $0x434] ss:$8 sps:$4 sm:$0xff]   ;;  %v4364_v32 = vld [vmem:[#allocation2 + $0x20] ss:$8 sps:$4 sm:$0xff]  }
  0xb6   :  { %2548 = vmatprep.subr.bf16.mxu1 %v4210_v33  ;;  %v4372_v33 = vld [vmem:[#allocation2 + $0x34] ss:$8 sps:$4 sm:$0xff]  }
  0xb8   :  { %773 = vmatpush1.bf16.msra.mxu0 %v4205_v34  ;;  %v4290_v34 = vld [vmem:[#allocation2 + $0x430] ss:$8 sps:$4 sm:$0xff]  }
  0xb9   :  { %2549 = vmatpush1.bf16.msra.mxu1 %v4208_v35  ;;  %774 = vmatprep.subr.bf16.mxu0 %v4213_v36  ;;  %v4295_v35 = vld [vmem:[#allocation2 + $0x444] ss:$8 sps:$4 sm:$0xff]   ;;  %v4370_v36 = vld [vmem:[#allocation2 + $0x30] ss:$8 sps:$4 sm:$0xff]  }
  0xba   :  { %2550 = vmatprep.subr.bf16.mxu1 %v4216_v37  ;;  %v4378_v37 = vld [vmem:[#allocation2 + $0x44] ss:$8 sps:$4 sm:$0xff]  }
  0xbc   :  { %775 = vmatpush1.bf16.msra.mxu0 %v4211_v38  ;;  %v4293_v38 = vld [vmem:[#allocation2 + $0x440] ss:$8 sps:$4 sm:$0xff]  }
  0xbd   :  { %2551 = vmatpush1.bf16.msra.mxu1 %v4214_v39  ;;  %776 = vmatprep.subr.bf16.mxu0 %v4219_v40  ;;  %v4298_v39 = vld [vmem:[#allocation2 + $0x454] ss:$8 sps:$4 sm:$0xff]   ;;  %v4376_v40 = vld [vmem:[#allocation2 + $0x40] ss:$8 sps:$4 sm:$0xff]  }
  0xbe   :  { %2552 = vmatprep.subr.bf16.mxu1 %v4222_v41  ;;  %v4384_v41 = vld [vmem:[#allocation2 + $0x54] ss:$8 sps:$4 sm:$0xff]  }
  0xc0   :  { %777 = vmatpush1.bf16.msra.mxu0 %v4217_v42  ;;  %v4296_v42 = vld [vmem:[#allocation2 + $0x450] ss:$8 sps:$4 sm:$0xff]  }
  0xc1   :  { %2553 = vmatpush1.bf16.msra.mxu1 %v4220_v43  ;;  %778 = vmatprep.subr.bf16.mxu0 %v4225_v44  ;;  %v4301_v43 = vld [vmem:[#allocation2 + $0x464] ss:$8 sps:$4 sm:$0xff]   ;;  %v4382_v44 = vld [vmem:[#allocation2 + $0x50] ss:$8 sps:$4 sm:$0xff]  }
  0xc2   :  { %2554 = vmatprep.subr.bf16.mxu1 %v4228_v45  ;;  %v4390_v45 = vld [vmem:[#allocation2 + $0x64] ss:$8 sps:$4 sm:$0xff]  }
  0xc4   :  { %779 = vmatpush1.bf16.msra.mxu0 %v4223_v46  ;;  %v4299_v46 = vld [vmem:[#allocation2 + $0x460] ss:$8 sps:$4 sm:$0xff]  }
  0xc5   :  { %2555 = vmatpush1.bf16.msra.mxu1 %v4226_v47  ;;  %780 = vmatprep.subr.bf16.mxu0 %v4231_v48  ;;  %v4304_v47 = vld [vmem:[#allocation2 + $0x474] ss:$8 sps:$4 sm:$0xff]   ;;  %v4388_v48 = vld [vmem:[#allocation2 + $0x60] ss:$8 sps:$4 sm:$0xff]  }
  0xc6   :  { %2556 = vmatprep.subr.bf16.mxu1 %v4234_v49  ;;  %v4396_v49 = vld [vmem:[#allocation2 + $0x74] ss:$8 sps:$4 sm:$0xff]  }
  0xc8   :  { %781 = vmatpush1.bf16.msra.mxu0 %v4229_v50  ;;  %v5138_v50 = vld [vmem:[%s5424_s1] sm:$0xff] }
  0xc9   :  { %2557 = vmatpush1.bf16.msra.mxu1 %v4232_v51  ;;  %782 = vmatprep.subr.bf16.mxu0 %v4237_v52  ;;  %v4302_v51 = vld [vmem:[#allocation2 + $0x470] ss:$8 sps:$4 sm:$0xff]   ;;  %v3563_v52 = vcombine.high %v5138_v50, %v5138_v50 }
  0xca   :  { %2558 = vmatprep.subr.bf16.mxu1 %v4240_v53  ;;  %v4307_v53 = vld [vmem:[#allocation2 + $0x484] ss:$8 sps:$4 sm:$0xff]  }
  0xcc   :  { %783 = vmatpush1.bf16.msra.mxu0 %v4235_v54  ;;  %v4394_v54 = vld [vmem:[#allocation2 + $0x70] ss:$8 sps:$4 sm:$0xff]  }
  0xcd   :  { %2559 = vmatpush1.bf16.msra.mxu1 %v4238_v55  ;;  %784 = vmatprep.subr.bf16.mxu0 %v4243_v56  ;;  %v4402_v55 = vld [vmem:[#allocation2 + $0x84] ss:$8 sps:$4 sm:$0xff]   ;;  %v4305_v56 = vld [vmem:[#allocation2 + $0x480] ss:$8 sps:$4 sm:$0xff]  }
  0xce   :  { %2560 = vmatprep.subr.bf16.mxu1 %v4246_v57  ;;  %v4310_v57 = vld [vmem:[#allocation2 + $0x494] ss:$8 sps:$4 sm:$0xff]  }
  0xd0   :  { %785 = vmatpush1.bf16.msra.mxu0 %v4241_v58  ;;  %v4400_v58 = vld [vmem:[#allocation2 + $0x80] ss:$8 sps:$4 sm:$0xff]  }
  0xd1   :  { %2561 = vmatpush1.bf16.msra.mxu1 %v4244_v59  ;;  %786 = vmatprep.subr.bf16.mxu0 %v4249_v60  ;;  %v4408_v59 = vld [vmem:[#allocation2 + $0x94] ss:$8 sps:$4 sm:$0xff]   ;;  %v4308_v60 = vld [vmem:[#allocation2 + $0x490] ss:$8 sps:$4 sm:$0xff]  }
  0xd2   :  { %2562 = vmatprep.subr.bf16.mxu1 %v4252_v61  ;;  %v4313_v61 = vld [vmem:[#allocation2 + $0x4a4] ss:$8 sps:$4 sm:$0xff]  }
  0xd4   :  { %787 = vmatpush1.bf16.msra.mxu0 %v4247_v62  ;;  %v4406_v62 = vld [vmem:[#allocation2 + $0x90] ss:$8 sps:$4 sm:$0xff]  }
  0xd5   :  { %2563 = vmatpush1.bf16.msra.mxu1 %v4250_v63  ;;  %788 = vmatprep.subr.bf16.mxu0 %v4255_v0  ;;  %v4416_v63 = vld [vmem:[#allocation2 + $0xa4] ss:$8 sps:$4 sm:$0xff]   ;;  %v4311_v0 = vld [vmem:[#allocation2 + $0x4a0] ss:$8 sps:$4 sm:$0xff]  }
  0xd6   :  { %2564 = vmatprep.subr.bf16.mxu1 %v4258_v1  ;;  %v4316_v1 = vld [vmem:[#allocation2 + $0x4b4] ss:$8 sps:$4 sm:$0xff]  }
  0xd8   :  { %789 = vmatpush1.bf16.msra.mxu0 %v4253_v2  ;;  %v4414_v2 = vld [vmem:[#allocation2 + $0xa0] ss:$8 sps:$4 sm:$0xff]  }
  0xd9   :  { %2565 = vmatpush1.bf16.msra.mxu1 %v4256_v3  ;;  %790 = vmatprep.subr.bf16.mxu0 %v4261_v4  ;;  %v4422_v3 = vld [vmem:[#allocation2 + $0xb4] ss:$8 sps:$4 sm:$0xff]   ;;  %v4314_v4 = vld [vmem:[#allocation2 + $0x4b0] ss:$8 sps:$4 sm:$0xff]  }
  0xda   :  { %2566 = vmatprep.subr.bf16.mxu1 %v4264_v5  ;;  %v4319_v5 = vld [vmem:[#allocation2 + $0x4c4] ss:$8 sps:$4 sm:$0xff]  }
  0xdc   :  { %791 = vmatpush1.bf16.msra.mxu0 %v4259_v6  ;;  %v4420_v6 = vld [vmem:[#allocation2 + $0xb0] ss:$8 sps:$4 sm:$0xff]  }
  0xdd   :  { %2567 = vmatpush1.bf16.msra.mxu1 %v4262_v7  ;;  %792 = vmatprep.subr.bf16.mxu0 %v4267_v8  ;;  %v4428_v7 = vld [vmem:[#allocation2 + $0xc4] ss:$8 sps:$4 sm:$0xff]   ;;  %v4317_v8 = vld [vmem:[#allocation2 + $0x4c0] ss:$8 sps:$4 sm:$0xff]  }
  0xde   :  { %2568 = vmatprep.subr.bf16.mxu1 %v4270_v9  ;;  %v4322_v9 = vld [vmem:[#allocation2 + $0x4d4] ss:$8 sps:$4 sm:$0xff]  }
  0xe0   :  { %793 = vmatpush1.bf16.msra.mxu0 %v4265_v10  ;;  %v4426_v10 = vld [vmem:[#allocation2 + $0xc0] ss:$8 sps:$4 sm:$0xff]  }
  0xe1   :  { %2569 = vmatpush1.bf16.msra.mxu1 %v4268_v11  ;;  %794 = vmatprep.subr.bf16.mxu0 %v4273_v12  ;;  %v4434_v11 = vld [vmem:[#allocation2 + $0xd4] ss:$8 sps:$4 sm:$0xff]   ;;  %v4320_v12 = vld [vmem:[#allocation2 + $0x4d0] ss:$8 sps:$4 sm:$0xff]  }
  0xe2   :  { %2570 = vmatprep.subr.bf16.mxu1 %v4276_v13  ;;  %v4325_v13 = vld [vmem:[#allocation2 + $0x4e4] ss:$8 sps:$4 sm:$0xff]  }
  0xe4   :  { %795 = vmatpush1.bf16.msra.mxu0 %v4271_v14  ;;  %v4432_v14 = vld [vmem:[#allocation2 + $0xd0] ss:$8 sps:$4 sm:$0xff]  }
  0xe5   :  { %2571 = vmatpush1.bf16.msra.mxu1 %v4274_v15  ;;  %2417 = vmatprep.subr.bf16.mxu0 %v4354_v20  ;;  %v4440_v15 = vld [vmem:[#allocation2 + $0xe4] ss:$8 sps:$4 sm:$0xff]   ;;  %v4328_v20 = vld [vmem:[#allocation2 + $0x4f4] ss:$8 sps:$4 sm:$0xff]  }
  0xe6   :  { %2581 = vmatprep.subr.bf16.mxu1 %v4283_v16  ;;  %v4323_v16 = vld [vmem:[#allocation2 + $0x4e0] ss:$8 sps:$4 sm:$0xff]  }
  0xe7   :  { %797 = vmatmul.mubr.bf16.vlgmr.msra.gmra.mrb[0].mxu0 %v3464_v21  ;;  %v4438_v21 = vld [vmem:[#allocation2 + $0xe0] ss:$8 sps:$4 sm:$0xff]  }
  0xe8   :  { %2573 = vmatmul.mubr.bf16.vlgmr.msra.gmra.mrb[0].mxu1 %v3568_v22  ;;  %2418 = vmatpush1.bf16.msra.mxu0 %v4352_v26  ;;  %v4446_v22 = vld [vmem:[#allocation2 + $0xf4] ss:$8 sps:$4 sm:$0xff]   ;;  %v4444_v26 = vld [vmem:[#allocation2 + $0xf0] ss:$8 sps:$4 sm:$0xff]  }
  0xe9   :  { %2582 = vmatpush1.bf16.msra.mxu1 %v4281_v23  ;;  %2613 = vmatprep.mubr.bf16.mxu1 %v3571_v25  ;;  %v4326_v23 = vld [vmem:[#allocation2 + $0x4f0] ss:$8 sps:$4 sm:$0xff]   ;;  %v5145_v25 = vld [vmem:[%s5424_s1 + $0x28] sm:$0xff] }
  0xea   :  { %2583 = vmatprep.subr.bf16.mxu1 %v4286_v24  ;;  %2419 = vmatprep.subr.bf16.mxu0 %v4360_v27  ;;  %v4333_v24 = vld [vmem:[#allocation2 + $0x504] ss:$8 sps:$4 sm:$0xff]  }
  0xeb   :  { %2449 = vmatprep.mubr.bf16.mxu0 %v3563_v52  ;;  %v4454_v27 = vld [vmem:[%s5429_s6 + $0x4] ss:$8 sps:$4 sm:$0xff]   ;;  %v4349_v52 = vld [vmem:[#allocation2 + $0x560] ss:$8 sps:$4 sm:$0xff]  }
  0xec   :  { %2420 = vmatpush1.bf16.msra.mxu0 %v4358_v18  ;;  %v4336_v18 = vld [vmem:[#allocation2 + $0x514] ss:$8 sps:$4 sm:$0xff]  }
  0xed   :  { %2584 = vmatpush1.bf16.msra.mxu1 %v4284_v28  ;;  %2421 = vmatprep.subr.bf16.mxu0 %v4366_v30  ;;  %v3570_v28 = vcombine.low %v5127_v17, %v5127_v17  ;;  %v3573_v30 = vcombine.high %v5145_v25, %v5145_v25  ;;  %v4460_v17 = vld [vmem:[%s5429_s6 + $0x14] ss:$8 sps:$4 sm:$0xff]  }
  0xee   :  { %2585 = vmatprep.subr.bf16.mxu1 %v4289_v29  ;;  %v4331_v29 = vld [vmem:[#allocation2 + $0x500] ss:$8 sps:$4 sm:$0xff]  }
  0xf0   :  { %2422 = vmatpush1.bf16.msra.mxu0 %v4364_v32  ;;  %v4334_v32 = vld [vmem:[#allocation2 + $0x510] ss:$8 sps:$4 sm:$0xff]  }
  0xf1   :  { %2586 = vmatpush1.bf16.msra.mxu1 %v4287_v19  ;;  %2423 = vmatprep.subr.bf16.mxu0 %v4372_v33  ;;  %v3562_v19 = vcombine.low %v5138_v50, %v5138_v50  ;;  %v4339_v33 = vld [vmem:[#allocation2 + $0x524] ss:$8 sps:$4 sm:$0xff]   ;;  %v4482_v50 = vld [vmem:[%s5429_s6 + $0x50] ss:$8 sps:$4 sm:$0xff]  }
  0xf2   :  { %2587 = vmatprep.subr.bf16.mxu1 %v4292_v31  ;;  %v4452_v31 = vld [vmem:[%s5429_s6] ss:$8 sps:$4 sm:$0xff]  }
  0xf4   :  { %2424 = vmatpush1.bf16.msra.mxu0 %v4370_v36  ;;  %v4337_v36 = vld [vmem:[#allocation2 + $0x520] ss:$8 sps:$4 sm:$0xff]  }
  0xf5   :  { %2588 = vmatpush1.bf16.msra.mxu1 %v4290_v34  ;;  %2425 = vmatprep.subr.bf16.mxu0 %v4378_v37  ;;  %v4458_v34 = vld [vmem:[%s5429_s6 + $0x10] ss:$8 sps:$4 sm:$0xff]   ;;  %v4342_v37 = vld [vmem:[#allocation2 + $0x534] ss:$8 sps:$4 sm:$0xff]  }
  0xf6   :  { %2589 = vmatprep.subr.bf16.mxu1 %v4295_v35  ;;  %v4466_v35 = vld [vmem:[%s5429_s6 + $0x24] ss:$8 sps:$4 sm:$0xff]  }
  0xf8   :  { %2426 = vmatpush1.bf16.msra.mxu0 %v4376_v40  ;;  %v4340_v40 = vld [vmem:[#allocation2 + $0x530] ss:$8 sps:$4 sm:$0xff]  }
  0xf9   :  { %2590 = vmatpush1.bf16.msra.mxu1 %v4293_v38  ;;  %2427 = vmatprep.subr.bf16.mxu0 %v4384_v41  ;;  %v4464_v38 = vld [vmem:[%s5429_s6 + $0x20] ss:$8 sps:$4 sm:$0xff]   ;;  %v4345_v41 = vld [vmem:[#allocation2 + $0x544] ss:$8 sps:$4 sm:$0xff]  }
  0xfa   :  { %2591 = vmatprep.subr.bf16.mxu1 %v4298_v39  ;;  %v4472_v39 = vld [vmem:[%s5429_s6 + $0x34] ss:$8 sps:$4 sm:$0xff]  }
  0xfc   :  { %2428 = vmatpush1.bf16.msra.mxu0 %v4382_v44  ;;  %v4343_v44 = vld [vmem:[#allocation2 + $0x540] ss:$8 sps:$4 sm:$0xff]  }
  0xfd   :  { %2592 = vmatpush1.bf16.msra.mxu1 %v4296_v42  ;;  %2429 = vmatprep.subr.bf16.mxu0 %v4390_v45  ;;  %v4470_v42 = vld [vmem:[%s5429_s6 + $0x30] ss:$8 sps:$4 sm:$0xff]   ;;  %v4348_v45 = vld [vmem:[#allocation2 + $0x554] ss:$8 sps:$4 sm:$0xff]  }
  0xfe   :  { %2593 = vmatprep.subr.bf16.mxu1 %v4301_v43  ;;  %v4478_v43 = vld [vmem:[%s5429_s6 + $0x44] ss:$8 sps:$4 sm:$0xff]  }
 0x100   :  { %2430 = vmatpush1.bf16.msra.mxu0 %v4388_v48  ;;  %v4346_v48 = vld [vmem:[#allocation2 + $0x550] ss:$8 sps:$4 sm:$0xff]  }
 0x101   :  { %2594 = vmatpush1.bf16.msra.mxu1 %v4299_v46  ;;  %2431 = vmatprep.subr.bf16.mxu0 %v4396_v49  ;;  %v4476_v46 = vld [vmem:[%s5429_s6 + $0x40] ss:$8 sps:$4 sm:$0xff]   ;;  %v4351_v49 = vld [vmem:[#allocation2 + $0x564] ss:$8 sps:$4 sm:$0xff]  }
 0x102   :  { %2595 = vmatprep.subr.bf16.mxu1 %v4304_v47  ;;  %v4484_v47 = vld [vmem:[%s5429_s6 + $0x54] ss:$8 sps:$4 sm:$0xff]  }
 0x104   :  { %2432 = vmatpush1.bf16.msra.mxu0 %v4394_v54  ;;  %v4488_v54 = vld [vmem:[%s5429_s6 + $0x60] ss:$8 sps:$4 sm:$0xff]  }
 0x105   :  { %2596 = vmatpush1.bf16.msra.mxu1 %v4302_v51  ;;  %2433 = vmatprep.subr.bf16.mxu0 %v4402_v55  ;;  %v4490_v51 = vld [vmem:[%s5429_s6 + $0x64] ss:$8 sps:$4 sm:$0xff]   ;;  %v4496_v55 = vld [vmem:[%s5429_s6 + $0x74] ss:$8 sps:$4 sm:$0xff]  }
 0x106   :  { %2597 = vmatprep.subr.bf16.mxu1 %v4307_v53  ;;  %v4357_v53 = vld [vmem:[#allocation2 + $0x574] ss:$8 sps:$4 sm:$0xff]  }
 0x108   :  { %2434 = vmatpush1.bf16.msra.mxu0 %v4400_v58  ;;  %v4494_v58 = vld [vmem:[%s5429_s6 + $0x70] ss:$8 sps:$4 sm:$0xff]  }
 0x109   :  { %2598 = vmatpush1.bf16.msra.mxu1 %v4305_v56  ;;  %2435 = vmatprep.subr.bf16.mxu0 %v4408_v59  ;;  %v4355_v56 = vld [vmem:[#allocation2 + $0x570] ss:$8 sps:$4 sm:$0xff]   ;;  %v4502_v59 = vld [vmem:[%s5429_s6 + $0x84] ss:$8 sps:$4 sm:$0xff]  }
 0x10a   :  { %2599 = vmatprep.subr.bf16.mxu1 %v4310_v57  ;;  %v4363_v57 = vld [vmem:[#allocation2 + $0x584] ss:$8 sps:$4 sm:$0xff]  }
 0x10c   :  { %2436 = vmatpush1.bf16.msra.mxu0 %v4406_v62  ;;  %v4500_v62 = vld [vmem:[%s5429_s6 + $0x80] ss:$8 sps:$4 sm:$0xff]  }
 0x10d   :  { %2600 = vmatpush1.bf16.msra.mxu1 %v4308_v60  ;;  %2437 = vmatprep.subr.bf16.mxu0 %v4416_v63  ;;  %v4361_v60 = vld [vmem:[#allocation2 + $0x580] ss:$8 sps:$4 sm:$0xff]   ;;  %v4508_v63 = vld [vmem:[%s5429_s6 + $0x94] ss:$8 sps:$4 sm:$0xff]  }
 0x10e   :  { %2601 = vmatprep.subr.bf16.mxu1 %v4313_v61  ;;  %v4369_v61 = vld [vmem:[#allocation2 + $0x594] ss:$8 sps:$4 sm:$0xff]  }
 0x110   :  { %2438 = vmatpush1.bf16.msra.mxu0 %v4414_v2  ;;  %v4506_v2 = vld [vmem:[%s5429_s6 + $0x90] ss:$8 sps:$4 sm:$0xff]  }
 0x111   :  { %2602 = vmatpush1.bf16.msra.mxu1 %v4311_v0  ;;  %2439 = vmatprep.subr.bf16.mxu0 %v4422_v3  ;;  %v4367_v0 = vld [vmem:[#allocation2 + $0x590] ss:$8 sps:$4 sm:$0xff]   ;;  %v4516_v3 = vld [vmem:[%s5429_s6 + $0xa4] ss:$8 sps:$4 sm:$0xff]  }
 0x112   :  { %2603 = vmatprep.subr.bf16.mxu1 %v4316_v1  ;;  %v4375_v1 = vld [vmem:[#allocation2 + $0x5a4] ss:$8 sps:$4 sm:$0xff]  }
 0x114   :  { %2440 = vmatpush1.bf16.msra.mxu0 %v4420_v6  ;;  %v4514_v6 = vld [vmem:[%s5429_s6 + $0xa0] ss:$8 sps:$4 sm:$0xff]  }
 0x115   :  { %2604 = vmatpush1.bf16.msra.mxu1 %v4314_v4  ;;  %2441 = vmatprep.subr.bf16.mxu0 %v4428_v7  ;;  %v4373_v4 = vld [vmem:[#allocation2 + $0x5a0] ss:$8 sps:$4 sm:$0xff]   ;;  %v4522_v7 = vld [vmem:[%s5429_s6 + $0xb4] ss:$8 sps:$4 sm:$0xff]  }
 0x116   :  { %2605 = vmatprep.subr.bf16.mxu1 %v4319_v5  ;;  %v4381_v5 = vld [vmem:[#allocation2 + $0x5b4] ss:$8 sps:$4 sm:$0xff]  }
 0x118   :  { %2442 = vmatpush1.bf16.msra.mxu0 %v4426_v10  ;;  %v4520_v10 = vld [vmem:[%s5429_s6 + $0xb0] ss:$8 sps:$4 sm:$0xff]  }
 0x119   :  { %2606 = vmatpush1.bf16.msra.mxu1 %v4317_v8  ;;  %2443 = vmatprep.subr.bf16.mxu0 %v4434_v11  ;;  %v4379_v8 = vld [vmem:[#allocation2 + $0x5b0] ss:$8 sps:$4 sm:$0xff]   ;;  %v4528_v11 = vld [vmem:[%s5429_s6 + $0xc4] ss:$8 sps:$4 sm:$0xff]  }
 0x11a   :  { %2607 = vmatprep.subr.bf16.mxu1 %v4322_v9  ;;  %v4387_v9 = vld [vmem:[#allocation2 + $0x5c4] ss:$8 sps:$4 sm:$0xff]  }
 0x11c   :  { %2444 = vmatpush1.bf16.msra.mxu0 %v4432_v14  ;;  %v4526_v14 = vld [vmem:[%s5429_s6 + $0xc0] ss:$8 sps:$4 sm:$0xff]  }
 0x11d   :  { %2608 = vmatpush1.bf16.msra.mxu1 %v4320_v12  ;;  %2445 = vmatprep.subr.bf16.mxu0 %v4440_v15  ;;  %v4385_v12 = vld [vmem:[#allocation2 + $0x5c0] ss:$8 sps:$4 sm:$0xff]   ;;  %v4534_v15 = vld [vmem:[%s5429_s6 + $0xd4] ss:$8 sps:$4 sm:$0xff]  }
 0x11e   :  { %2609 = vmatprep.subr.bf16.mxu1 %v4325_v13  ;;  %v4393_v13 = vld [vmem:[#allocation2 + $0x5d4] ss:$8 sps:$4 sm:$0xff]  }
 0x120   :  { %2446 = vmatpush1.bf16.msra.mxu0 %v4438_v21  ;;  %v4532_v21 = vld [vmem:[%s5429_s6 + $0xd0] ss:$8 sps:$4 sm:$0xff]  }
 0x121   :  { %2610 = vmatpush1.bf16.msra.mxu1 %v4323_v16  ;;  %2447 = vmatprep.subr.bf16.mxu0 %v4446_v22  ;;  %v4391_v16 = vld [vmem:[#allocation2 + $0x5d0] ss:$8 sps:$4 sm:$0xff]   ;;  %v4540_v22 = vld [vmem:[%s5429_s6 + $0xe4] ss:$8 sps:$4 sm:$0xff]  }
 0x122   :  { %2611 = vmatprep.subr.bf16.mxu1 %v4328_v20  ;;  %v4399_v20 = vld [vmem:[#allocation2 + $0x5e4] ss:$8 sps:$4 sm:$0xff]  }
 0x124   :  { %2448 = vmatpush1.bf16.msra.mxu0 %v4444_v26  ;;  %v4538_v26 = vld [vmem:[%s5429_s6 + $0xe0] ss:$8 sps:$4 sm:$0xff]  }
 0x125   :  { %2612 = vmatpush1.bf16.msra.mxu1 %v4326_v23  ;;  %2951 = vmatprep.subr.bf16.mxu0 %v4454_v27  ;;  %v4397_v23 = vld [vmem:[#allocation2 + $0x5e0] ss:$8 sps:$4 sm:$0xff]   ;;  %v4546_v27 = vld [vmem:[%s5429_s6 + $0xf4] ss:$8 sps:$4 sm:$0xff]  }
 0x126   :  { %2622 = vmatprep.subr.bf16.mxu1 %v4333_v24  ;;  %v4405_v24 = vld [vmem:[#allocation2 + $0x5f4] ss:$8 sps:$4 sm:$0xff]  }
 0x127   :  { %2450 = vmatmul.mubr.bf16.vlgmr.msra.gmra.mrb[4].mxu0 %v3562_v19  ;;  %v3572_v19 = vcombine.low %v5145_v25, %v5145_v25  ;;  %v4423_v25 = vld [vmem:[#allocation2 + $0x620] ss:$8 sps:$4 sm:$0xff]  }
 0x128   :  { %2614 = vmatmul.mubr.bf16.vlgmr.msra.gmra.mrb[0].mxu1 %v3570_v28  ;;  %2952 = vmatpush1.bf16.msra.mxu0 %v4452_v31  ;;  %v4403_v28 = vld [vmem:[#allocation2 + $0x5f0] ss:$8 sps:$4 sm:$0xff]   ;;  %v4411_v31 = vld [vmem:[#allocation2 + $0x600] ss:$8 sps:$4 sm:$0xff]  }
 0x129   :  { %2623 = vmatpush1.bf16.msra.mxu1 %v4331_v29  ;;  %2654 = vmatprep.mubr.bf16.mxu1 %v3573_v30  ;;  %v4413_v29 = vld [vmem:[#allocation2 + $0x604] ss:$8 sps:$4 sm:$0xff]   ;;  %v4544_v30 = vld [vmem:[%s5429_s6 + $0xf0] ss:$8 sps:$4 sm:$0xff]  }
 0x12a   :  { %2624 = vmatprep.subr.bf16.mxu1 %v4336_v18  ;;  %2953 = vmatprep.subr.bf16.mxu0 %v4460_v17  ;;  %v5249_v18 = vld [vmem:[%s5424_s1 + $0x30] sm:$0xff] }
 0x12b   :  { %v3575_v17 = vcombine.high %v5249_v18, %v5249_v18 }
 0x12c   :  { %2954 = vmatpush1.bf16.msra.mxu0 %v4458_v34  ;;  %v4417_v34 = vld [vmem:[#allocation2 + $0x610] ss:$8 sps:$4 sm:$0xff]  }
 0x12d   :  { %2625 = vmatpush1.bf16.msra.mxu1 %v4334_v32  ;;  %2955 = vmatprep.subr.bf16.mxu0 %v4466_v35  ;;  %v4419_v32 = vld [vmem:[#allocation2 + $0x614] ss:$8 sps:$4 sm:$0xff]   ;;  %v4425_v35 = vld [vmem:[#allocation2 + $0x624] ss:$8 sps:$4 sm:$0xff]  }
 0x12e   :  { %2626 = vmatprep.subr.bf16.mxu1 %v4339_v33  ;;  %v4581_v33 = vld [vmem:[%s5431_s8 + $0x4] ss:$8 sps:$4 sm:$0xff]  }
 0x130   :  { %2956 = vmatpush1.bf16.msra.mxu0 %v4464_v38  ;;  %v4437_v38 = vld [vmem:[#allocation2 + $0x644] ss:$8 sps:$4 sm:$0xff]  }
 0x131   :  { %2627 = vmatpush1.bf16.msra.mxu1 %v4337_v36  ;;  %2957 = vmatprep.subr.bf16.mxu0 %v4472_v39  ;;  %v4431_v36 = vld [vmem:[#allocation2 + $0x634] ss:$8 sps:$4 sm:$0xff]   ;;  %v4435_v39 = vld [vmem:[#allocation2 + $0x640] ss:$8 sps:$4 sm:$0xff]  }
 0x132   :  { %2628 = vmatprep.subr.bf16.mxu1 %v4342_v37  ;;  %v4429_v37 = vld [vmem:[#allocation2 + $0x630] ss:$8 sps:$4 sm:$0xff]  }
 0x134   :  { %2958 = vmatpush1.bf16.msra.mxu0 %v4470_v42  ;;  %v4449_v42 = vld [vmem:[#allocation2 + $0x664] ss:$8 sps:$4 sm:$0xff]  }
 0x135   :  { %2629 = vmatpush1.bf16.msra.mxu1 %v4340_v40  ;;  %2959 = vmatprep.subr.bf16.mxu0 %v4478_v43  ;;  %v4443_v40 = vld [vmem:[#allocation2 + $0x654] ss:$8 sps:$4 sm:$0xff]   ;;  %v4447_v43 = vld [vmem:[#allocation2 + $0x660] ss:$8 sps:$4 sm:$0xff]  }
 0x136   :  { %2630 = vmatprep.subr.bf16.mxu1 %v4345_v41  ;;  %v4441_v41 = vld [vmem:[#allocation2 + $0x650] ss:$8 sps:$4 sm:$0xff]  }
 0x138   :  { %2960 = vmatpush1.bf16.msra.mxu0 %v4476_v46  ;;  %v4463_v46 = vld [vmem:[#allocation2 + $0x684] ss:$8 sps:$4 sm:$0xff]  }
 0x139   :  { %2631 = vmatpush1.bf16.msra.mxu1 %v4343_v44  ;;  %2961 = vmatprep.subr.bf16.mxu0 %v4484_v47  ;;  %v4457_v44 = vld [vmem:[#allocation2 + $0x674] ss:$8 sps:$4 sm:$0xff]   ;;  %v4461_v47 = vld [vmem:[#allocation2 + $0x680] ss:$8 sps:$4 sm:$0xff]  }
 0x13a   :  { %2632 = vmatprep.subr.bf16.mxu1 %v4348_v45  ;;  %v4455_v45 = vld [vmem:[#allocation2 + $0x670] ss:$8 sps:$4 sm:$0xff]  }
 0x13c   :  { %2962 = vmatpush1.bf16.msra.mxu0 %v4482_v50  ;;  %v4475_v50 = vld [vmem:[#allocation2 + $0x6a4] ss:$8 sps:$4 sm:$0xff]  }
 0x13d   :  { %2633 = vmatpush1.bf16.msra.mxu1 %v4346_v48  ;;  %2963 = vmatprep.subr.bf16.mxu0 %v4490_v51  ;;  %v4469_v48 = vld [vmem:[#allocation2 + $0x694] ss:$8 sps:$4 sm:$0xff]   ;;  %v4473_v51 = vld [vmem:[#allocation2 + $0x6a0] ss:$8 sps:$4 sm:$0xff]  }
 0x13e   :  { %2634 = vmatprep.subr.bf16.mxu1 %v4351_v49  ;;  %v4467_v49 = vld [vmem:[#allocation2 + $0x690] ss:$8 sps:$4 sm:$0xff]  }
 0x140   :  { %2964 = vmatpush1.bf16.msra.mxu0 %v4488_v54  ;;  %v4487_v54 = vld [vmem:[#allocation2 + $0x6c4] ss:$8 sps:$4 sm:$0xff]  }
 0x141   :  { %2635 = vmatpush1.bf16.msra.mxu1 %v4349_v52  ;;  %2965 = vmatprep.subr.bf16.mxu0 %v4496_v55  ;;  %v4481_v52 = vld [vmem:[#allocation2 + $0x6b4] ss:$8 sps:$4 sm:$0xff]   ;;  %v4485_v55 = vld [vmem:[#allocation2 + $0x6c0] ss:$8 sps:$4 sm:$0xff]  }
 0x142   :  { %2636 = vmatprep.subr.bf16.mxu1 %v4357_v53  ;;  %v4479_v53 = vld [vmem:[#allocation2 + $0x6b0] ss:$8 sps:$4 sm:$0xff]  }
 0x144   :  { %2966 = vmatpush1.bf16.msra.mxu0 %v4494_v58  ;;  %v4499_v58 = vld [vmem:[#allocation2 + $0x6e4] ss:$8 sps:$4 sm:$0xff]  }
 0x145   :  { %2637 = vmatpush1.bf16.msra.mxu1 %v4355_v56  ;;  %2967 = vmatprep.subr.bf16.mxu0 %v4502_v59  ;;  %v4493_v56 = vld [vmem:[#allocation2 + $0x6d4] ss:$8 sps:$4 sm:$0xff]   ;;  %v4497_v59 = vld [vmem:[#allocation2 + $0x6e0] ss:$8 sps:$4 sm:$0xff]  }
 0x146   :  { %2638 = vmatprep.subr.bf16.mxu1 %v4363_v57  ;;  %v4491_v57 = vld [vmem:[#allocation2 + $0x6d0] ss:$8 sps:$4 sm:$0xff]  }
 0x148   :  { %2968 = vmatpush1.bf16.msra.mxu0 %v4500_v62  ;;  %v4513_v62 = vld [vmem:[#allocation2 + $0x704] ss:$8 sps:$4 sm:$0xff]  }
 0x149   :  { %2639 = vmatpush1.bf16.msra.mxu1 %v4361_v60  ;;  %2969 = vmatprep.subr.bf16.mxu0 %v4508_v63  ;;  %v4505_v60 = vld [vmem:[#allocation2 + $0x6f4] ss:$8 sps:$4 sm:$0xff]  }
 0x14a   :  { %2640 = vmatprep.subr.bf16.mxu1 %v4369_v61  ;;  %v4503_v61 = vld [vmem:[#allocation2 + $0x6f0] ss:$8 sps:$4 sm:$0xff]  }
 0x14b   :  { %v5264_v63 = vld [vmem:[%s5424_s1 + $0x38] sm:$0xff] }
 0x14c   :  { %2970 = vmatpush1.bf16.msra.mxu0 %v4506_v2  ;;  %v3577_v2 = vcombine.high %v5264_v63, %v5264_v63 }
 0x14d   :  { %2641 = vmatpush1.bf16.msra.mxu1 %v4367_v0  ;;  %2971 = vmatprep.subr.bf16.mxu0 %v4516_v3  ;;  %v3574_v0 = vcombine.low %v5249_v18, %v5249_v18  ;;  %v4519_v3 = vld [vmem:[#allocation2 + $0x714] ss:$8 sps:$4 sm:$0xff]  }
 0x14e   :  { %2642 = vmatprep.subr.bf16.mxu1 %v4375_v1  ;;  %v4511_v1 = vld [vmem:[#allocation2 + $0x700] ss:$8 sps:$4 sm:$0xff]  }
 0x150   :  { %2972 = vmatpush1.bf16.msra.mxu0 %v4514_v6  ;;  %v171_v6 = vlaneseq }
 0x151   :  { %2643 = vmatpush1.bf16.msra.mxu1 %v4373_v4  ;;  %2973 = vmatprep.subr.bf16.mxu0 %v4522_v7  ;;  %v4517_v4 = vld [vmem:[#allocation2 + $0x710] ss:$8 sps:$4 sm:$0xff]   ;;  %v4523_v7 = vld [vmem:[#allocation2 + $0x720] ss:$8 sps:$4 sm:$0xff]  }
 0x152   :  { %2644 = vmatprep.subr.bf16.mxu1 %v4381_v5  ;;  %v4525_v5 = vld [vmem:[#allocation2 + $0x724] ss:$8 sps:$4 sm:$0xff]  }
 0x154   :  { %2974 = vmatpush1.bf16.msra.mxu0 %v4520_v10  ;;  %v4529_v10 = vld [vmem:[#allocation2 + $0x730] ss:$8 sps:$4 sm:$0xff]  }
 0x155   :  { %2645 = vmatpush1.bf16.msra.mxu1 %v4379_v8  ;;  %2975 = vmatprep.subr.bf16.mxu0 %v4528_v11  ;;  %v4531_v8 = vld [vmem:[#allocation2 + $0x734] ss:$8 sps:$4 sm:$0xff]   ;;  %v4537_v11 = vld [vmem:[#allocation2 + $0x744] ss:$8 sps:$4 sm:$0xff]  }
 0x156   :  { %2646 = vmatprep.subr.bf16.mxu1 %v4387_v9  ;;  %v172_v9 = vshrl.u32 %v171_v6, 7  ;;  %v4608_v6 = vld [vmem:[%s5431_s8 + $0x94] ss:$8 sps:$4 sm:$0xff]  }
 0x158   :  { %2976 = vmatpush1.bf16.msra.mxu0 %v4526_v14  ;;  %v169_v14 = vld [vmem:[%s5426_s3] sm:$0x3] }
 0x159   :  { %2647 = vmatpush1.bf16.msra.mxu1 %v4385_v12  ;;  %2977 = vmatprep.subr.bf16.mxu0 %v4534_v15  ;;  %v5270_v12 = vsub.s32 0, %v172_v9  ;;  %v5275_v15 = vsub.s32 1, %v172_v9  ;;  %v4609_v9 = vld [vmem:[%s5431_s8 + $0xa0] ss:$8 sps:$4 sm:$0xff]  }
 0x15a   :  { %2648 = vmatprep.subr.bf16.mxu1 %v4393_v13  ;;  %v4535_v13 = vld [vmem:[#allocation2 + $0x740] ss:$8 sps:$4 sm:$0xff]  }
 0x15c   :  { %2978 = vmatpush1.bf16.msra.mxu0 %v4532_v21  ;;  %v178_v21 = vrot.slane %v169_v14, %v5275_v15 }
 0x15d   :  { %2649 = vmatpush1.bf16.msra.mxu1 %v4391_v16  ;;  %2979 = vmatprep.subr.bf16.mxu0 %v4540_v22  ;;  %v4543_v16 = vld [vmem:[#allocation2 + $0x754] ss:$8 sps:$4 sm:$0xff]   ;;  %v4541_v22 = vld [vmem:[#allocation2 + $0x750] ss:$8 sps:$4 sm:$0xff]  }
 0x15e   :  { %2650 = vmatprep.subr.bf16.mxu1 %v4399_v20  ;;  %v174_v20 = vrot.slane %v169_v14, %v5270_v12  ;;  %v4615_v14 = vld [vmem:[%s5431_s8 + $0xc0] ss:$8 sps:$4 sm:$0xff]  }
 0x160   :  { %2980 = vmatpush1.bf16.msra.mxu0 %v4538_v26 }
 0x161   :  { %2651 = vmatpush1.bf16.msra.mxu1 %v4397_v23  ;;  %2981 = vmatprep.subr.bf16.mxu0 %v4546_v27  ;;  %v4549_v23 = vld [vmem:[#allocation2 + $0x764] ss:$8 sps:$4 sm:$0xff]  }
 0x162   :  { %2652 = vmatprep.subr.bf16.mxu1 %v4405_v24 }
 0x164   :  { %2982 = vmatpush1.bf16.msra.mxu0 %v4544_v30 }
 0x165   :  { %2653 = vmatpush1.bf16.msra.mxu1 %v4403_v28  ;;  %3198 = vmatprep.subr.bf16.mxu0 %v4581_v33  ;;  %v4584_v33 = vld [vmem:[%s5431_s8 + $0x14] ss:$8 sps:$4 sm:$0xff]  }
 0x166   :  { %2663 = vmatprep.subr.bf16.mxu1 %v4413_v29  ;;  %v4547_v29 = vld [vmem:[#allocation2 + $0x760] ss:$8 sps:$4 sm:$0xff]  }
 0x168   :  { %2655 = vmatmul.mubr.bf16.vlgmr.msra.gmra.mrb[0].mxu1 %v3572_v19  ;;  %v4552_v19 = vld [vmem:[#allocation2 + $0x774] ss:$8 sps:$4 sm:$0xff]  }
 0x169   :  { %2664 = vmatpush1.bf16.msra.mxu1 %v4411_v31  ;;  %2695 = vmatprep.mubr.bf16.mxu1 %v3575_v17 }
 0x16a   :  { %2665 = vmatprep.subr.bf16.mxu1 %v4419_v32  ;;  %v4579_v32 = vld [vmem:[%s5431_s8] ss:$8 sps:$4 sm:$0xff]  }
 0x16d   :  { %2666 = vmatpush1.bf16.msra.mxu1 %v4417_v34  ;;  %v4550_v34 = vld [vmem:[#allocation2 + $0x770] ss:$8 sps:$4 sm:$0xff]  }
 0x16e   :  { %2667 = vmatprep.subr.bf16.mxu1 %v4425_v35  ;;  %v4555_v35 = vld [vmem:[#allocation2 + $0x784] ss:$8 sps:$4 sm:$0xff]  }
 0x171   :  { %2668 = vmatpush1.bf16.msra.mxu1 %v4423_v25  ;;  %v4582_v25 = vld [vmem:[%s5431_s8 + $0x10] ss:$8 sps:$4 sm:$0xff]  }
 0x172   :  { %2669 = vmatprep.subr.bf16.mxu1 %v4431_v36  ;;  %v4587_v36 = vld [vmem:[%s5431_s8 + $0x24] ss:$8 sps:$4 sm:$0xff]  }
 0x175   :  { %2670 = vmatpush1.bf16.msra.mxu1 %v4429_v37  ;;  %v4553_v37 = vld [vmem:[#allocation2 + $0x780] ss:$8 sps:$4 sm:$0xff]  }
 0x176   :  { %2671 = vmatprep.subr.bf16.mxu1 %v4437_v38  ;;  %v4558_v38 = vld [vmem:[#allocation2 + $0x794] ss:$8 sps:$4 sm:$0xff]  }
 0x179   :  { %2672 = vmatpush1.bf16.msra.mxu1 %v4435_v39  ;;  %v4585_v39 = vld [vmem:[%s5431_s8 + $0x20] ss:$8 sps:$4 sm:$0xff]  }
 0x17a   :  { %2673 = vmatprep.subr.bf16.mxu1 %v4443_v40  ;;  %v4590_v40 = vld [vmem:[%s5431_s8 + $0x34] ss:$8 sps:$4 sm:$0xff]  }
 0x17d   :  { %2674 = vmatpush1.bf16.msra.mxu1 %v4441_v41  ;;  %v4556_v41 = vld [vmem:[#allocation2 + $0x790] ss:$8 sps:$4 sm:$0xff]  }
 0x17e   :  { %2675 = vmatprep.subr.bf16.mxu1 %v4449_v42  ;;  %v4561_v42 = vld [vmem:[#allocation2 + $0x7a4] ss:$8 sps:$4 sm:$0xff]  }
 0x181   :  { %2676 = vmatpush1.bf16.msra.mxu1 %v4447_v43  ;;  %v4588_v43 = vld [vmem:[%s5431_s8 + $0x30] ss:$8 sps:$4 sm:$0xff]  }
 0x182   :  { %2677 = vmatprep.subr.bf16.mxu1 %v4457_v44  ;;  %v4593_v44 = vld [vmem:[%s5431_s8 + $0x44] ss:$8 sps:$4 sm:$0xff]  }
 0x185   :  { %2678 = vmatpush1.bf16.msra.mxu1 %v4455_v45  ;;  %v4559_v45 = vld [vmem:[#allocation2 + $0x7a0] ss:$8 sps:$4 sm:$0xff]  }
 0x186   :  { %2679 = vmatprep.subr.bf16.mxu1 %v4463_v46  ;;  %v4564_v46 = vld [vmem:[#allocation2 + $0x7b4] ss:$8 sps:$4 sm:$0xff]  }
 0x189   :  { %2680 = vmatpush1.bf16.msra.mxu1 %v4461_v47  ;;  %v4591_v47 = vld [vmem:[%s5431_s8 + $0x40] ss:$8 sps:$4 sm:$0xff]  }
 0x18a   :  { %2681 = vmatprep.subr.bf16.mxu1 %v4469_v48  ;;  %v4562_v48 = vld [vmem:[#allocation2 + $0x7b0] ss:$8 sps:$4 sm:$0xff]  }
 0x18d   :  { %2682 = vmatpush1.bf16.msra.mxu1 %v4467_v49  ;;  %v4567_v49 = vld [vmem:[#allocation2 + $0x7c4] ss:$8 sps:$4 sm:$0xff]  }
 0x18e   :  { %2683 = vmatprep.subr.bf16.mxu1 %v4475_v50  ;;  %v4565_v50 = vld [vmem:[#allocation2 + $0x7c0] ss:$8 sps:$4 sm:$0xff]  }
 0x191   :  { %2684 = vmatpush1.bf16.msra.mxu1 %v4473_v51  ;;  %v4570_v51 = vld [vmem:[#allocation2 + $0x7d4] ss:$8 sps:$4 sm:$0xff]  }
 0x192   :  { %2685 = vmatprep.subr.bf16.mxu1 %v4481_v52  ;;  %v4568_v52 = vld [vmem:[#allocation2 + $0x7d0] ss:$8 sps:$4 sm:$0xff]  }
 0x195   :  { %2686 = vmatpush1.bf16.msra.mxu1 %v4479_v53  ;;  %v4573_v53 = vld [vmem:[#allocation2 + $0x7e4] ss:$8 sps:$4 sm:$0xff]  }
 0x196   :  { %2687 = vmatprep.subr.bf16.mxu1 %v4487_v54  ;;  %v4571_v54 = vld [vmem:[#allocation2 + $0x7e0] ss:$8 sps:$4 sm:$0xff]  }
 0x199   :  { %2688 = vmatpush1.bf16.msra.mxu1 %v4485_v55  ;;  %v4576_v55 = vld [vmem:[#allocation2 + $0x7f4] ss:$8 sps:$4 sm:$0xff]  }
 0x19a   :  { %2689 = vmatprep.subr.bf16.mxu1 %v4493_v56  ;;  %v4574_v56 = vld [vmem:[#allocation2 + $0x7f0] ss:$8 sps:$4 sm:$0xff]  }
 0x19d   :  { %2690 = vmatpush1.bf16.msra.mxu1 %v4491_v57  ;;  %v3576_v57 = vcombine.low %v5264_v63, %v5264_v63  ;;  %v4597_v63 = vld [vmem:[%s5431_s8 + $0x60] ss:$8 sps:$4 sm:$0xff]  }
 0x19e   :  { %2691 = vmatprep.subr.bf16.mxu1 %v4499_v58 }
 0x1a1   :  { %2692 = vmatpush1.bf16.msra.mxu1 %v4497_v59 }
 0x1a2   :  { %2693 = vmatprep.subr.bf16.mxu1 %v4505_v60 }
 0x1a5   :  { %2694 = vmatpush1.bf16.msra.mxu1 %v4503_v61 }
 0x1a6   :  { %2704 = vmatprep.subr.bf16.mxu1 %v4513_v62  ;;  %v4596_v62 = vld [vmem:[%s5431_s8 + $0x54] ss:$8 sps:$4 sm:$0xff]  }
 0x1a8   :  { %2696 = vmatmul.mubr.bf16.vlgmr.msra.gmra.mrb[0].mxu1 %v3574_v0  ;;  %v4594_v0 = vld [vmem:[%s5431_s8 + $0x50] ss:$8 sps:$4 sm:$0xff]  }
 0x1a9   :  { %2705 = vmatpush1.bf16.msra.mxu1 %v4511_v1  ;;  %2736 = vmatprep.mubr.bf16.mxu1 %v3577_v2  ;;  %v4599_v1 = vld [vmem:[%s5431_s8 + $0x64] ss:$8 sps:$4 sm:$0xff]   ;;  %v4600_v2 = vld [vmem:[%s5431_s8 + $0x70] ss:$8 sps:$4 sm:$0xff]  }
 0x1aa   :  { %2706 = vmatprep.subr.bf16.mxu1 %v4519_v3  ;;  %v4602_v3 = vld [vmem:[%s5431_s8 + $0x74] ss:$8 sps:$4 sm:$0xff]  }
 0x1ad   :  { %2707 = vmatpush1.bf16.msra.mxu1 %v4517_v4  ;;  %v4605_v4 = vld [vmem:[%s5431_s8 + $0x84] ss:$8 sps:$4 sm:$0xff]  }
 0x1ae   :  { %2708 = vmatprep.subr.bf16.mxu1 %v4525_v5  ;;  %v4603_v5 = vld [vmem:[%s5431_s8 + $0x80] ss:$8 sps:$4 sm:$0xff]  }
 0x1b1   :  { %2709 = vmatpush1.bf16.msra.mxu1 %v4523_v7  ;;  %v4606_v7 = vld [vmem:[%s5431_s8 + $0x90] ss:$8 sps:$4 sm:$0xff]  }
 0x1b2   :  { %2710 = vmatprep.subr.bf16.mxu1 %v4531_v8  ;;  %v4611_v8 = vld [vmem:[%s5431_s8 + $0xa4] ss:$8 sps:$4 sm:$0xff]  }
 0x1b5   :  { %2711 = vmatpush1.bf16.msra.mxu1 %v4529_v10  ;;  %v4614_v10 = vld [vmem:[%s5431_s8 + $0xb4] ss:$8 sps:$4 sm:$0xff]  }
 0x1b6   :  { %2712 = vmatprep.subr.bf16.mxu1 %v4537_v11  ;;  %v4612_v11 = vld [vmem:[%s5431_s8 + $0xb0] ss:$8 sps:$4 sm:$0xff]  }
 0x1b9   :  { %2713 = vmatpush1.bf16.msra.mxu1 %v4535_v13  ;;  %v4617_v13 = vld [vmem:[%s5431_s8 + $0xc4] ss:$8 sps:$4 sm:$0xff]  }
 0x1ba   :  { %2714 = vmatprep.subr.bf16.mxu1 %v4543_v16  ;;  %v798_v24 = vpop.f32.mrb[0].mxu0  ;;  %v4620_v16 = vld [vmem:[%s5431_s8 + $0xd4] ss:$8 sps:$4 sm:$0xff]  }
 0x1bb   :  { %v5279_v26 = vadd.f32 %v798_v24, %v174_v20  ;;  %v800_v27 = vpop.f32.mrb[1].mxu0  ;;  %v4618_v20 = vld [vmem:[%s5431_s8 + $0xd0] ss:$8 sps:$4 sm:$0xff]  }
 0x1bc   :  { %v5281_v28 = vadd.f32 %v800_v27, %v178_v21  ;;  %v802_v18 = vpop.f32.mrb[2].mxu0  ;;  %v4623_v21 = vld [vmem:[%s5431_s8 + $0xe4] ss:$8 sps:$4 sm:$0xff]   ;;  %v4624_v24 = vld [vmem:[%s5431_s8 + $0xf0] ss:$8 sps:$4 sm:$0xff]  }
 0x1bd   :  { %2715 = vmatpush1.bf16.msra.mxu1 %v4541_v22  ;;  %v2745_v30 = vpack.c.bf16 %v5279_v26, %v5279_v26  ;;  %v803_v31 = vpop.f32.mrb[3].mxu0  ;;  %v4621_v22 = vld [vmem:[%s5431_s8 + $0xe0] ss:$8 sps:$4 sm:$0xff]  }
 0x1be   :  { %2716 = vmatprep.subr.bf16.mxu1 %v4549_v23  ;;  %v2746_v17 = vpack.c.bf16 %v5281_v28, %v5281_v28  ;;  %v4626_v23 = vld [vmem:[%s5431_s8 + $0xf4] ss:$8 sps:$4 sm:$0xff]   ;;  %v2779_v27 = vld [vmem:[%s5430_s7] sm:$0x3] }
 0x1bf   :  { %v2788_v18 = vrot.slane %v2779_v27, %v5275_v15 }
 0x1c0   :  { %2983 = vmatprep.mubr.bf16.mxu0 %v2746_v17 }
 0x1c1   :  { %2717 = vmatpush1.bf16.msra.mxu1 %v4547_v29  ;;  %2984 = vmatmul.mubr.bf16.vlgmr.msra.gmra.mrb[8].mxu0 %v2745_v30  ;;  %v2784_v29 = vrot.slane %v2779_v27, %v5270_v12  ;;  %v4640_v27 = vld [vmem:[#allocation4 + $0x30] sm:$0xff]  }
 0x1c2   :  { %2718 = vmatprep.subr.bf16.mxu1 %v4552_v19  ;;  %3199 = vmatpush1.bf16.msra.mxu0 %v4579_v32 }
 0x1c3   :  { %3200 = vmatprep.subr.bf16.mxu0 %v4584_v33 }
 0x1c5   :  { %2719 = vmatpush1.bf16.msra.mxu1 %v4550_v34 }
 0x1c6   :  { %2720 = vmatprep.subr.bf16.mxu1 %v4555_v35  ;;  %3201 = vmatpush1.bf16.msra.mxu0 %v4582_v25  ;;  %v1069_v35 = vld [vmem:[%s5428_s5] sm:$0x3] }
 0x1c7   :  { %3202 = vmatprep.subr.bf16.mxu0 %v4587_v36  ;;  %v1074_v25 = vrot.slane %v1069_v35, %v5270_v12  ;;  %v1078_v36 = vrot.slane %v1069_v35, %v5275_v15 }
 0x1c9   :  { %2721 = vmatpush1.bf16.msra.mxu1 %v4553_v37 }
 0x1ca   :  { %2722 = vmatprep.subr.bf16.mxu1 %v4558_v38  ;;  %3203 = vmatpush1.bf16.msra.mxu0 %v4585_v39 }
 0x1cb   :  { %3204 = vmatprep.subr.bf16.mxu0 %v4590_v40 }
 0x1cd   :  { %2723 = vmatpush1.bf16.msra.mxu1 %v4556_v41 }
 0x1ce   :  { %2724 = vmatprep.subr.bf16.mxu1 %v4561_v42  ;;  %3205 = vmatpush1.bf16.msra.mxu0 %v4588_v43 }
 0x1cf   :  { %3206 = vmatprep.subr.bf16.mxu0 %v4593_v44 }
 0x1d1   :  { %2725 = vmatpush1.bf16.msra.mxu1 %v4559_v45 }
 0x1d2   :  { %2726 = vmatprep.subr.bf16.mxu1 %v4564_v46  ;;  %3207 = vmatpush1.bf16.msra.mxu0 %v4591_v47 }
 0x1d3   :  { %3208 = vmatprep.subr.bf16.mxu0 %v4596_v62 }
 0x1d5   :  { %2727 = vmatpush1.bf16.msra.mxu1 %v4562_v48 }
 0x1d6   :  { %2728 = vmatprep.subr.bf16.mxu1 %v4567_v49  ;;  %3209 = vmatpush1.bf16.msra.mxu0 %v4594_v0 }
 0x1d7   :  { %3210 = vmatprep.subr.bf16.mxu0 %v4599_v1  ;;  %v4627_v1 = vld [vmem:[#allocation4 + $0x40] sm:$0xff]  }
 0x1d9   :  { %2729 = vmatpush1.bf16.msra.mxu1 %v4565_v50 }
 0x1da   :  { %2730 = vmatprep.subr.bf16.mxu1 %v4570_v51  ;;  %3211 = vmatpush1.bf16.msra.mxu0 %v4597_v63 }
 0x1db   :  { %3212 = vmatprep.subr.bf16.mxu0 %v4602_v3  ;;  %v4629_v3 = vld [vmem:[#allocation4 + $0x48] sm:$0xff]  }
 0x1dd   :  { %2731 = vmatpush1.bf16.msra.mxu1 %v4568_v52 }
 0x1de   :  { %2732 = vmatprep.subr.bf16.mxu1 %v4573_v53  ;;  %3213 = vmatpush1.bf16.msra.mxu0 %v4600_v2  ;;  %v4628_v2 = vld [vmem:[#allocation4] sm:$0xff]  }
 0x1df   :  { %3214 = vmatprep.subr.bf16.mxu0 %v4605_v4  ;;  %v4630_v4 = vld [vmem:[#allocation4 + $0x8] sm:$0xff]  }
 0x1e1   :  { %2733 = vmatpush1.bf16.msra.mxu1 %v4571_v54 }
 0x1e2   :  { %2734 = vmatprep.subr.bf16.mxu1 %v4576_v55  ;;  %3215 = vmatpush1.bf16.msra.mxu0 %v4603_v5  ;;  %v3026_v55 = vld [vmem:[%s5432_s9] sm:$0x3]  ;;  %v4631_v5 = vld [vmem:[#allocation4 + $0x50] sm:$0xff]  }
 0x1e3   :  { %3216 = vmatprep.subr.bf16.mxu0 %v4608_v6 }
 0x1e5   :  { %2735 = vmatpush1.bf16.msra.mxu1 %v4574_v56  ;;  %v3031_v56 = vrot.slane %v3026_v55, %v5270_v12  ;;  %v4632_v12 = vld [vmem:[#allocation4 + $0x10] sm:$0xff]  }
 0x1e6   :  { %3217 = vmatpush1.bf16.msra.mxu0 %v4606_v7 }
 0x1e7   :  { %3218 = vmatprep.subr.bf16.mxu0 %v4611_v8 }
 0x1e8   :  { %2737 = vmatmul.mubr.bf16.vlgmr.msra.gmra.mrb[0].mxu1 %v3576_v57  ;;  %v3035_v57 = vrot.slane %v3026_v55, %v5275_v15 }
 0x1ea   :  { %3219 = vmatpush1.bf16.msra.mxu0 %v4609_v9 }
 0x1eb   :  { %3220 = vmatprep.subr.bf16.mxu0 %v4614_v10 }
 0x1ee   :  { %3221 = vmatpush1.bf16.msra.mxu0 %v4612_v11 }
 0x1ef   :  { %3222 = vmatprep.subr.bf16.mxu0 %v4617_v13 }
 0x1f2   :  { %3223 = vmatpush1.bf16.msra.mxu0 %v4615_v14  ;;  %v4633_v14 = vld [vmem:[#allocation4 + $0x58] sm:$0xff]  }
 0x1f3   :  { %3224 = vmatprep.subr.bf16.mxu0 %v4620_v16  ;;  %v4634_v16 = vld [vmem:[#allocation4 + $0x18] sm:$0xff]  }
 0x1f6   :  { %3225 = vmatpush1.bf16.msra.mxu0 %v4618_v20  ;;  %v4635_v20 = vld [vmem:[#allocation4 + $0x60] sm:$0xff]  }
 0x1f7   :  { %3226 = vmatprep.subr.bf16.mxu0 %v4623_v21  ;;  %v4636_v21 = vld [vmem:[#allocation4 + $0x20] sm:$0xff]  }
 0x1fa   :  { %v2451_v58 = vpop.f32.mrb[4].mxu0  ;;  %3227 = vmatpush1.bf16.msra.mxu0 %v4621_v22  ;;  %v4637_v22 = vld [vmem:[#allocation4 + $0x68] sm:$0xff]  }
 0x1fb   :  { %v2453_v59 = vpop.f32.mrb[5].mxu0  ;;  %3228 = vmatprep.subr.bf16.mxu0 %v4626_v23  ;;  %v2452_v37 = vadd.f32 %v2451_v58, %v1074_v25  ;;  %v4638_v23 = vld [vmem:[#allocation4 + $0x28] sm:$0xff]  }
 0x1fc   :  { %v2455_v60 = vpop.f32.mrb[6].mxu0  ;;  %v2454_v38 = vadd.f32 %v2453_v59, %v1078_v36 }
 0x1fd   :  { %v2456_v61 = vpop.f32.mrb[7].mxu0 }
 0x1fe   :  { %3229 = vmatpush1.bf16.msra.mxu0 %v4624_v24  ;;  %v4639_v24 = vld [vmem:[#allocation4 + $0x70] sm:$0xff]  }
 0x1ff   :  { %3915 = vmatprep.subr.bf16.mxu0 %v4627_v1 }
 0x294   :  { %v2985_v30 = vpop.f32.mrb[8].mxu0 }
 0x295   :  { %v2986_v19 = vadd.f32 %v2985_v30, %v2784_v29  ;;  %v2987_v31 = vpop.f32.mrb[9].mxu0  ;;  %v4641_v29 = vld [vmem:[#allocation4 + $0x78] sm:$0xff]  }
 0x296   :  { %v2988_v17 = vadd.f32 %v2987_v31, %v2788_v18  ;;  %v2989_v32 = vpop.f32.mrb[10].mxu0  ;;  %v4642_v18 = vld [vmem:[#allocation4 + $0x38] sm:$0xff]  }
 0x297   :  { %v2990_v33 = vpop.f32.mrb[11].mxu0 }
 0x298   :  { %v3239_v34 = vmax.f32 %v2986_v19, %v2988_v17 }
 0x29a   :  { %3240 = vmax.xlane.f32.xlu0 %v3239_v34 }
 0x2bb   :  { %v2738_v39 = vpop.f32.mrb[0].mxu1 }
 0x2bc   :  { %v5392_v40 = vadd.f32 %v2738_v39, %v2452_v37  ;;  %v2740_v41 = vpop.f32.mrb[1].mxu1 }
 0x2bd   :  { %v5394_v42 = vadd.f32 %v2740_v41, %v2454_v38  ;;  %v2742_v43 = vpop.f32.mrb[2].mxu1 }
 0x2be   :  { %v2743_v44 = vpop.f32.mrb[3].mxu1  ;;  %v2992_v46 = vpack.c.bf16 %v5392_v40, %v5392_v40 }
 0x2bf   :  { %v2993_v45 = vpack.c.bf16 %v5394_v42, %v5394_v42 }
 0x2c1   :  { %3230 = vmatprep.mubr.bf16.mxu0 %v2993_v45 }
 0x2c2   :  { %3231 = vmatmul.mubr.bf16.vlgmr.msra.gmra.mrb[12].mxu0 %v2992_v46  ;;  %v3898_v46 = vld [vmem:[%s5434_s11] ss:$0 sm:$0xff] }
 0x2c3   :  { %3916 = vmatpush3.bf16.msra.mxu0 %v4628_v2 }
 0x2c4   :  { %3917 = vmatprep.subr.bf16.mxu0 %v4629_v3 }
 0x2c7   :  { %3918 = vmatpush3.bf16.msra.mxu0 %v4630_v4 }
 0x2c8   :  { %3919 = vmatprep.subr.bf16.mxu0 %v4631_v5 }
 0x2cb   :  { %3920 = vmatpush3.bf16.msra.mxu0 %v4632_v12 }
 0x2cc   :  { %3921 = vmatprep.subr.bf16.mxu0 %v4633_v14 }
 0x2cf   :  { %3922 = vmatpush3.bf16.msra.mxu0 %v4634_v16 }
 0x2d0   :  { %3923 = vmatprep.subr.bf16.mxu0 %v4635_v20 }
 0x2d3   :  { %3924 = vmatpush3.bf16.msra.mxu0 %v4636_v21 }
 0x2d4   :  { %3925 = vmatprep.subr.bf16.mxu0 %v4637_v22 }
 0x2d7   :  { %3926 = vmatpush3.bf16.msra.mxu0 %v4638_v23 }
 0x2d8   :  { %3927 = vmatprep.subr.bf16.mxu0 %v4639_v24 }
 0x2db   :  { %3928 = vmatpush3.bf16.msra.mxu0 %v4640_v27 }
 0x2dc   :  { %3929 = vmatprep.subr.bf16.mxu0 %v4641_v29 }
 0x2df   :  { %3930 = vmatpush3.bf16.msra.mxu0 %v4642_v18 }
 0x327   :  { %v3241_v47 = vpop.xlane.xlu0 %3240 }
 0x328   :  { %v3242_v48 = vsub.f32 %v2986_v19, %v3241_v47  ;;  %v3243_v49 = vsub.f32 %v2988_v17, %v3241_v47 }
 0x32a   :  { %v3244_v50 = vmul.f32 1.442695, %v3242_v48  ;;  %v3246_v51 = vmul.f32 1.442695, %v3243_v49 }
 0x32c   :  { %4643 = vpow2.f32 %v3244_v50 }
 0x32d   :  { %4645 = vpow2.f32 %v3246_v51 }
 0x336   :  { %v5400_v52 = vpop.eup %4643 }
 0x337   :  { %v5402_v53 = vpop.eup %4645 }
 0x338   :  { %v3248_v54 = vadd.f32 %v5402_v53, %v5400_v52 }
 0x33a   :  { %3249 = vadd.xlane.f32.xlu1 %v3248_v54 }
 0x395   :  { %v3232_v58 = vpop.f32.mrb[12].mxu0 }
 0x396   :  { %v3233_v59 = vadd.f32 %v3232_v58, %v3031_v56  ;;  %v3234_v60 = vpop.f32.mrb[13].mxu0 }
 0x397   :  { %v3235_v61 = vadd.f32 %v3234_v60, %v3035_v57  ;;  %v3236_v62 = vpop.f32.mrb[14].mxu0 }
 0x398   :  { %v3237_v0 = vpop.f32.mrb[15].mxu0 }
 0x399   :  { %v3254_v63 = vmax.f32 %v3233_v59, %v3235_v61 }
 0x39b   :  { %3255 = vmax.xlane.f32.xlu0 %v3254_v63 }
 0x3c7   :  { %v3250_v30 = vpop.xlane.xlu1 %3249 }
 0x428   :  { %v3256_v15 = vpop.xlane.xlu0 %3255 }
 0x429   :  { %v3257_v6 = vsub.f32 %v3233_v59, %v3256_v15  ;;  %v3258_v7 = vsub.f32 %v3235_v61, %v3256_v15 }
 0x42b   :  { %v3259_v8 = vmul.f32 1.442695, %v3257_v6  ;;  %v3261_v9 = vmul.f32 1.442695, %v3258_v7 }
 0x42d   :  { %4647 = vpow2.f32 %v3259_v8 }
 0x42e   :  { %4649 = vpow2.f32 %v3261_v9 }
 0x42f   :  { %4651 = vrcp.f32 %v3250_v30 }
 0x437   :  { %v4648_v10 = vpop.eup %4647 }
 0x438   :  { %v4650_v11 = vpop.eup %4649 }
 0x439   :  { %v3263_v13 = vadd.f32 %v4650_v11, %v4648_v10  ;;  %v4652_v31 = vpop.eup %4651 }
 0x43a   :  { %v3252_v17 = vmul.f32 %v4652_v31, %v5400_v52  ;;  %v3253_v32 = vmul.f32 %v4652_v31, %v5402_v53 }
 0x43b   :  { %3264 = vadd.xlane.f32.xlu1 %v3263_v13 }
 0x43c   :  { %v3270_v25 = vmul.f32 %v5281_v28, %v3253_v32  ;;  %v3269_v37 = vmul.f32 %v5279_v26, %v3252_v17 }
 0x4c8   :  { %v3265_v19 = vpop.xlane.xlu1 %3264 }
 0x4c9   :  { %4653 = vrcp.f32 %v3265_v19 }
 0x4d3   :  { %v4654_v33 = vpop.eup %4653 }
 0x4d4   :  { %v3267_v34 = vmul.f32 %v4654_v33, %v4648_v10  ;;  %v3268_v35 = vmul.f32 %v4654_v33, %v4650_v11 }
 0x4d6   :  { %v3272_v36 = vmul.f32 %v5394_v42, %v3268_v35  ;;  %v3271_v38 = vmul.f32 %v5392_v40, %v3267_v34 }
 0x4d8   :  { %v3274_v39 = vadd.f32 %v3272_v36, %v3270_v25  ;;  %v3273_v41 = vadd.f32 %v3271_v38, %v3269_v37 }
 0x4da   :  { %v3276_v43 = vpack.c.bf16 %v3274_v39, %v3274_v39  ;;  %v3275_v44 = vpack.c.bf16 %v3273_v41, %v3273_v41 }
 0x4dc   :  { %3444 = vmatprep.mubr.bf16.mxu0 %v3276_v43 }
 0x4dd   :  { %3445 = vmatmul.mubr.bf16.vlgmr.msra.gmra.mrb[16].mxu0 %v3275_v44 }
 0x5b0   :  { %v3931_v45 = vpop.f32.mrb[16].mxu0 }
 0x5b1   :  { %v3932_v47 = vpop.f32.mrb[17].mxu0 }
 0x5b2   :  { %v3933_v48 = vadd.f32 %v3932_v47, %v3931_v45  ;;  %v3934_v28 = vpop.f32.mrb[18].mxu0 }
 0x5b3   :  { %v3935_v49 = vpop.f32.mrb[19].mxu0 }
 0x5b4   :  { %v3447_v42 = vadd.f32 %v3933_v48, %v3898_v46 }
 0x5b6   :  { %v3452_v50 = vpack.c.bf16 %v3447_v42, %v3447_v42 }
 0x5b8   :  { %3453 = vst [vmem:[%s5435_s12] sm:$0xf] %v3452_v50 }
 0x5b9   :  { %3458 = vsyncpa [#allocation3], 1 }
 0x5ba   :  { %3459 = vsyncpa [#allocation5], 1 }

</bundles_post_ra>
